<compile_context>
chip_gen: v5e
topology: v5e:2x2
jax: 0.10.0
libtpu: 0.0.40
codegen_flags: <defaults>
</compile_context>

<pallas_src>
import functools

import jax
import jax.numpy as jnp
from jax.experimental import pallas as pl
from jax.experimental.pallas import tpu as pltpu

LABEL_KNOTS = 64
PIC_KNOTS = 512 - LABEL_KNOTS     # 448
SCALE = 0.2                       # leaky_relu negative slope
P_DROPOUT = 0.5                   # TODO(synk): dropout implemented as identity (eval mode)

PIC_IN = 784                      # 28 * 28
LAB_IN = 10
K1 = 896                          # fused first-layer contraction dim: 784 + 10 + pad -> 7*128
H = 512                           # hidden width (= PIC_KNOTS + LABEL_KNOTS)


def _round_up(n, m):
    return (n + m - 1) // m * m


def _cdiv(a, b):
    return (a + b - 1) // b


# ---------------------------------------------------------------------------
# Generation-aware configuration (tile size, elementwise dtype, VMEM budget).
# ---------------------------------------------------------------------------
_CFG = None


def _tpu_config():
    kind = ""
    try:
        kind = jax.devices()[0].device_kind.lower()
    except Exception:
        pass
    if any(t in kind for t in ("v2", "v3", "v4", "v5")):
        # v5e and older: slower MXU already hides step overhead at TB=512; no
        # bf16 VALU, so keep elementwise in f32; stay under 16 MiB scoped VMEM.
        return dict(max_tb=512, elem_dtype=jnp.float32, vmem_limit=None,
                    split_two=False)
    if "v6" in kind:
        # v6e: 128 MiB physical VMEM; big tiles amortize per-step overhead.
        return dict(max_tb=2048, elem_dtype=jnp.bfloat16,
                    vmem_limit=64 * 1024 * 1024, split_two=False)
    # v7x (2 TCs, 64 MiB VMEM/TC) or unknown newer chip: conservative VMEM
    # budget and prefer >=2 grid steps so ("parallel",) uses both TensorCores.
    return dict(max_tb=2048, elem_dtype=jnp.bfloat16,
                vmem_limit=48 * 1024 * 1024, split_two=True)


def get_config():
    global _CFG
    if _CFG is None:
        _CFG = _tpu_config()
    return _CFG


# ---------------------------------------------------------------------------
# Kernel
# ---------------------------------------------------------------------------
def dis_kernel(x_ref, w1_ref, b1_ref, w2_ref, b2_ref, w3_ref, b3_ref, out_ref,
               *, elem_dtype):
    # x_ref: (TB, 896) bf16 = [img(784) | label(10) | 0-pad(102)]
    x = x_ref[...]

    # fused fc1_1 / fc1_2 via block-diagonal W1 (MXU, f32 accumulation)
    h = jnp.dot(x, w1_ref[...], preferred_element_type=jnp.float32)
    h = h.astype(elem_dtype) + b1_ref[...]
    h = jnp.maximum(h, SCALE * h)                    # leaky_relu (mul+max)
    # dropout1: identity (eval mode)

    # fc2 + leaky_relu (bf16 operands on the MXU, f32 accumulation)
    h = jnp.dot(h.astype(jnp.bfloat16), w2_ref[...],
                preferred_element_type=jnp.float32)
    h = h.astype(elem_dtype) + b2_ref[...]
    h = jnp.maximum(h, SCALE * h)
    # dropout2: identity (eval mode)

    # fc3 (N=1): VPU multiply + XLU lane-reduction instead of an MXU matmul
    logits = jnp.sum(h.astype(jnp.float32) * w3_ref[...],
                     axis=-1, keepdims=True) + b3_ref[...]
    out_ref[...] = jax.nn.sigmoid(logits)            # (TB, 1) f32


# ---------------------------------------------------------------------------
# Host-side packing / wrapper
# ---------------------------------------------------------------------------
def pack_params(params, elem_dtype=jnp.float32):
    """Fuse (in,out)-layout params into the kernel layout (done once, host-side)."""
    w11, b11, w12, b12, w2, b2, w3, b3 = params
    # block-diagonal fused first-layer weight: (896, 512); label rows at 784..793
    w1 = jnp.zeros((K1, H), jnp.float32)
    w1 = w1.at[:PIC_IN, :PIC_KNOTS].set(w11)
    w1 = w1.at[PIC_IN:PIC_IN + LAB_IN, PIC_KNOTS:].set(w12)
    b1 = jnp.concatenate([b11, b12], axis=1)                     # (1, 512)
    return (w1.astype(jnp.bfloat16), b1.astype(elem_dtype),
            w2.astype(jnp.bfloat16), b2.astype(elem_dtype),
            w3.reshape(1, H).astype(jnp.float32), b3.astype(jnp.float32))


def _choose_tile(B, cfg):
    n_tiles = max(1, _cdiv(B, cfg["max_tb"]))
    if cfg["split_two"] and n_tiles < 2 and B >= 512:
        n_tiles = 2                         # give v7x's 2nd TensorCore work
    tb = min(cfg["max_tb"], _round_up(_cdiv(B, n_tiles), 8))
    bp = _round_up(B, tb)
    return tb, bp


def dis_forward(image, label, packed):
    """image: (B, 1, 28, 28) or (B, 784); label: (B, 10)."""
    cfg = get_config()
    w1, b1, w2, b2, w3_row, b3 = packed
    B = image.shape[0]
    TB, Bp = _choose_tile(B, cfg)

    # Build the fused input directly in bf16 at the 896-wide layout:
    # [img(784) | label(10) | 0-pad(102)], batch padded to a tile multiple.
    x = image.reshape(B, -1).astype(jnp.bfloat16)                # nn.Flatten
    lab = label.astype(jnp.bfloat16)
    xcat = jnp.pad(jnp.concatenate([x, lab], axis=1),
                   ((0, Bp - B), (0, K1 - PIC_IN - LAB_IN)))     # (Bp, 896) bf16

    grid = (Bp // TB,)
    flops = 2 * Bp * (K1 * H + H * H + H)
    elem_bytes = jnp.dtype(cfg["elem_dtype"]).itemsize
    bytes_accessed = (xcat.size * 2 + Bp * 4                     # input + output
                      + (w1.size + w2.size) * 2
                      + (b1.size + b2.size) * elem_bytes
                      + (w3_row.size + b3.size) * 4)

    cp_kwargs = dict(dimension_semantics=("parallel",))          # 2-TC on v7x
    if cfg["vmem_limit"] is not None:
        cp_kwargs["vmem_limit_bytes"] = cfg["vmem_limit"]

    out = pl.pallas_call(
        functools.partial(dis_kernel, elem_dtype=cfg["elem_dtype"]),
        out_shape=jax.ShapeDtypeStruct((Bp, 1), jnp.float32),
        grid=grid,
        in_specs=[
            pl.BlockSpec((TB, K1), lambda i: (i, 0)),   # input tile: pipelined
            pl.BlockSpec((K1, H), lambda i: (0, 0)),    # W1: VMEM-resident
            pl.BlockSpec((1, H), lambda i: (0, 0)),     # b1
            pl.BlockSpec((H, H), lambda i: (0, 0)),     # W2
            pl.BlockSpec((1, H), lambda i: (0, 0)),     # b2
            pl.BlockSpec((1, H), lambda i: (0, 0)),     # w3 row
            pl.BlockSpec((1, 1), lambda i: (0, 0)),     # b3
        ],
        out_specs=pl.BlockSpec((TB, 1), lambda i: (i, 0)),
        compiler_params=pltpu.CompilerParams(**cp_kwargs),
        cost_estimate=pl.CostEstimate(
            flops=flops, transcendentals=Bp, bytes_accessed=bytes_accessed),
    )(xcat, w1, b1, w2, b2, w3_row, b3)

    return out[:B]                                      # drop batch padding


# ---------------------------------------------------------------------------
# Pure-JAX reference + init
# ---------------------------------------------------------------------------
def _leaky_relu_ref(x, slope):
    return jnp.where(x > 0, x, slope * x)


def dis_reference(image, label, params):
    """Pure-JAX f32 reference matching the torch forward (dropout in eval mode)."""
    w11, b11, w12, b12, w2, b2, w3, b3 = params
    B = image.shape[0]
    x = image.reshape(B, -1).astype(jnp.float32)
    x1 = _leaky_relu_ref(x @ w11 + b11, SCALE)
    x2 = _leaky_relu_ref(label.astype(jnp.float32) @ w12 + b12, SCALE)
    h = jnp.concatenate([x1, x2], axis=1)
    h = _leaky_relu_ref(h @ w2 + b2, SCALE)
    return jax.nn.sigmoid(h @ w3 + b3)


def init_params(key):
    """Deterministic init. Weights stored as (in_features, out_features)."""
    ks = jax.random.split(key, 8)

    def linear(kw, kb, fan_in, fan_out):
        # mimic torch.nn.Linear default init: U(-1/sqrt(fan_in), 1/sqrt(fan_in))
        bound = 1.0 / jnp.sqrt(fan_in)
        w = jax.random.uniform(kw, (fan_in, fan_out), jnp.float32, -bound, bound)
        b = jax.random.uniform(kb, (1, fan_out), jnp.float32, -bound, bound)
        return w, b

    w11, b11 = linear(ks[0], ks[1], PIC_IN, PIC_KNOTS)   # fc1_1: 784 -> 448
    w12, b12 = linear(ks[2], ks[3], LAB_IN, LABEL_KNOTS) # fc1_2: 10  -> 64
    w2, b2 = linear(ks[4], ks[5], 512, 512)              # fc2:   512 -> 512
    w3, b3 = linear(ks[6], ks[7], 512, 1)                # fc3:   512 -> 1
    return (w11, b11, w12, b12, w2, b2, w3, b3)


if __name__ == "__main__":
    key = jax.random.PRNGKey(0)
    k_img, k_lab, k_par = jax.random.split(key, 3)

    B = 2
    image = jax.random.normal(k_img, (B, 1, 28, 28), jnp.float32)   # MNIST-like
    labels_idx = jax.random.randint(k_lab, (B,), 0, 10)
    label = jax.nn.one_hot(labels_idx, 10, dtype=jnp.float32)       # (B, 10)

    params = init_params(k_par)
    packed = pack_params(params, elem_dtype=get_config()["elem_dtype"])

    out = dis_forward(image, label, packed)
    out = jax.block_until_ready(out)

    assert out.shape == (B, 1)
    assert bool(jnp.all((out >= 0.0) & (out <= 1.0)))

    # loose tolerance vs. f32 reference: kernel matmuls (and, on v6e/v7x,
    # elementwise ops) use bf16
    ref = dis_reference(image, label, params)
    assert bool(jnp.allclose(out, ref, atol=3e-2)), (out, ref)

    print("KERNEL_OK")
</pallas_src>

<mosaic_0001>
module attributes {stable_mosaic.version = 11 : i64} {
  func.func @dis_kernel(%arg0: i32, %arg1: memref<8x896xbf16, #tpu.memory_space<vmem>>, %arg2: memref<896x512xbf16, #tpu.memory_space<vmem>>, %arg3: memref<1x512xbf16, #tpu.memory_space<vmem>>, %arg4: memref<512x512xbf16, #tpu.memory_space<vmem>>, %arg5: memref<1x512xbf16, #tpu.memory_space<vmem>>, %arg6: memref<1x512xf32, #tpu.memory_space<vmem>>, %arg7: memref<1x1xf32, #tpu.memory_space<vmem>>, %arg8: memref<8x1xf32, #tpu.memory_space<vmem>>) attributes {dimension_semantics = [#tpu.dimension_semantics<parallel>], iteration_bounds = array<i64: 1>, scalar_prefetch = 0 : i64, scratch_operands = 0 : i64, tpu.core_type = #tpu.core_type<tc>, window_params = [{transform_indices = @transform_0, window_bounds = array<i64: 8, 896>}, {pipeline_mode = #tpu.pipeline_mode<synchronous>, transform_indices = @transform_1, window_bounds = array<i64: 896, 512>}, {pipeline_mode = #tpu.pipeline_mode<synchronous>, transform_indices = @transform_2, window_bounds = array<i64: 1, 512>}, {pipeline_mode = #tpu.pipeline_mode<synchronous>, transform_indices = @transform_3, window_bounds = array<i64: 512, 512>}, {pipeline_mode = #tpu.pipeline_mode<synchronous>, transform_indices = @transform_4, window_bounds = array<i64: 1, 512>}, {pipeline_mode = #tpu.pipeline_mode<synchronous>, transform_indices = @transform_5, window_bounds = array<i64: 1, 512>}, {pipeline_mode = #tpu.pipeline_mode<synchronous>, transform_indices = @transform_6, window_bounds = array<i64: 1, 1>}, {transform_indices = @transform_7, window_bounds = array<i64: 8, 1>}]} {
    %c0 = arith.constant 0 : index
    %c0_0 = arith.constant 0 : index
    %0 = vector.load %arg1[%c0, %c0_0] : memref<8x896xbf16, #tpu.memory_space<vmem>>, vector<8x896xbf16>
    %c0_1 = arith.constant 0 : index
    %c0_2 = arith.constant 0 : index
    %1 = vector.load %arg2[%c0_1, %c0_2] : memref<896x512xbf16, #tpu.memory_space<vmem>>, vector<896x512xbf16>
    %cst = arith.constant dense<0.000000e+00> : vector<8x512xf32>
    %2 = tpu.matmul %0, %1, %cst {dimension_numbers = #tpu.dot_dimension_numbers<[1], [0], [0], [1], [0, 0, 1, 1], [], []>} : vector<8x896xbf16>, vector<896x512xbf16>, vector<8x512xf32> -> vector<8x512xf32>
    %3 = arith.truncf %2 : vector<8x512xf32> to vector<8x512xbf16>
    %c0_3 = arith.constant 0 : index
    %c0_4 = arith.constant 0 : index
    %4 = vector.load %arg3[%c0_3, %c0_4] : memref<1x512xbf16, #tpu.memory_space<vmem>>, vector<1x512xbf16>
    %5 = vector.broadcast %4 : vector<1x512xbf16> to vector<8x512xbf16>
    %6 = arith.addf %3, %5 : vector<8x512xbf16>
    %cst_5 = arith.constant 2.001950e-01 : bf16
    %7 = vector.broadcast %cst_5 : bf16 to vector<8x512xbf16>
    %8 = arith.mulf %7, %6 : vector<8x512xbf16>
    %9 = arith.maximumf %6, %8 : vector<8x512xbf16>
    %c0_6 = arith.constant 0 : index
    %c0_7 = arith.constant 0 : index
    %10 = vector.load %arg4[%c0_6, %c0_7] : memref<512x512xbf16, #tpu.memory_space<vmem>>, vector<512x512xbf16>
    %cst_8 = arith.constant dense<0.000000e+00> : vector<8x512xf32>
    %11 = tpu.matmul %9, %10, %cst_8 {dimension_numbers = #tpu.dot_dimension_numbers<[1], [0], [0], [1], [0, 0, 1, 1], [], []>} : vector<8x512xbf16>, vector<512x512xbf16>, vector<8x512xf32> -> vector<8x512xf32>
    %12 = arith.truncf %11 : vector<8x512xf32> to vector<8x512xbf16>
    %c0_9 = arith.constant 0 : index
    %c0_10 = arith.constant 0 : index
    %13 = vector.load %arg5[%c0_9, %c0_10] : memref<1x512xbf16, #tpu.memory_space<vmem>>, vector<1x512xbf16>
    %14 = vector.broadcast %13 : vector<1x512xbf16> to vector<8x512xbf16>
    %15 = arith.addf %12, %14 : vector<8x512xbf16>
    %cst_11 = arith.constant 2.001950e-01 : bf16
    %16 = vector.broadcast %cst_11 : bf16 to vector<8x512xbf16>
    %17 = arith.mulf %16, %15 : vector<8x512xbf16>
    %18 = arith.maximumf %15, %17 : vector<8x512xbf16>
    %19 = arith.extf %18 : vector<8x512xbf16> to vector<8x512xf32>
    %c0_12 = arith.constant 0 : index
    %c0_13 = arith.constant 0 : index
    %20 = vector.load %arg6[%c0_12, %c0_13] : memref<1x512xf32, #tpu.memory_space<vmem>>, vector<1x512xf32>
    %21 = vector.broadcast %20 : vector<1x512xf32> to vector<8x512xf32>
    %22 = arith.mulf %19, %21 : vector<8x512xf32>
    %cst_14 = arith.constant dense<0.000000e+00> : vector<8xf32>
    %23 = vector.multi_reduction <add>, %22, %cst_14 [1] : vector<8x512xf32> to vector<8xf32>
    %24 = vector.shape_cast %23 : vector<8xf32> to vector<8x1xf32>
    %c0_15 = arith.constant 0 : index
    %c0_16 = arith.constant 0 : index
    %25 = vector.load %arg7[%c0_15, %c0_16] : memref<1x1xf32, #tpu.memory_space<vmem>>, vector<1x1xf32>
    %26 = vector.broadcast %25 : vector<1x1xf32> to vector<8x1xf32>
    %27 = arith.addf %24, %26 : vector<8x1xf32>
    %28 = arith.negf %27 : vector<8x1xf32>
    %29 = math.exp %28 : vector<8x1xf32>
    %cst_17 = arith.constant 1.000000e+00 : f32
    %30 = vector.broadcast %cst_17 : f32 to vector<8x1xf32>
    %31 = arith.addf %30, %29 : vector<8x1xf32>
    %32 = arith.divf %30, %31 : vector<8x1xf32>
    %c0_18 = arith.constant 0 : index
    %c0_19 = arith.constant 0 : index
    %33 = vector.load %arg8[%c0_18, %c0_19] : memref<8x1xf32, #tpu.memory_space<vmem>>, vector<8x1xf32>
    tpu.vector_store %arg8[%c0_18, %c0_19], %32 {strides = array<i32>} : memref<8x1xf32, #tpu.memory_space<vmem>>, vector<8x1xf32>,
    return
  }
  func.func @transform_0(%arg0: i32) -> (i32, i32) {
    %c0_i32 = arith.constant 0 : i32
    %c0_i32_0 = arith.constant 0 : i32
    return %arg0, %c0_i32 : i32, i32
  }
  func.func @transform_1(%arg0: i32) -> (i32, i32) {
    %c0_i32 = arith.constant 0 : i32
    %c0_i32_0 = arith.constant 0 : i32
    %c0_i32_1 = arith.constant 0 : i32
    return %c0_i32, %c0_i32_0 : i32, i32
  }
  func.func @transform_2(%arg0: i32) -> (i32, i32) {
    %c0_i32 = arith.constant 0 : i32
    %c0_i32_0 = arith.constant 0 : i32
    %c0_i32_1 = arith.constant 0 : i32
    return %c0_i32, %c0_i32_0 : i32, i32
  }
  func.func @transform_3(%arg0: i32) -> (i32, i32) {
    %c0_i32 = arith.constant 0 : i32
    %c0_i32_0 = arith.constant 0 : i32
    %c0_i32_1 = arith.constant 0 : i32
    return %c0_i32, %c0_i32_0 : i32, i32
  }
  func.func @transform_4(%arg0: i32) -> (i32, i32) {
    %c0_i32 = arith.constant 0 : i32
    %c0_i32_0 = arith.constant 0 : i32
    %c0_i32_1 = arith.constant 0 : i32
    return %c0_i32, %c0_i32_0 : i32, i32
  }
  func.func @transform_5(%arg0: i32) -> (i32, i32) {
    %c0_i32 = arith.constant 0 : i32
    %c0_i32_0 = arith.constant 0 : i32
    %c0_i32_1 = arith.constant 0 : i32
    return %c0_i32, %c0_i32_0 : i32, i32
  }
  func.func @transform_6(%arg0: i32) -> (i32, i32) {
    %c0_i32 = arith.constant 0 : i32
    %c0_i32_0 = arith.constant 0 : i32
    %c0_i32_1 = arith.constant 0 : i32
    return %c0_i32, %c0_i32_0 : i32, i32
  }
  func.func @transform_7(%arg0: i32) -> (i32, i32) {
    %c0_i32 = arith.constant 0 : i32
    %c0_i32_0 = arith.constant 0 : i32
    return %arg0, %c0_i32 : i32, i32
  }
}

</mosaic_0001>

<bundles_post_ra>
// kernel: tpu_custom_call.1
= control target key start
LH: loop header
LB: loop body
LE: loop exit
PB: predicated region body
PF: predicated region fallthrough
CT: control target
= control target key end

     0   :  { %s5065_s0 = inlined_call_operand.hbm [shape: bf16[8,896], index: 0, kind: input, shape index: {}]   ;;  %s5066_s1 = inlined_call_operand.hbm [shape: bf16[896,512], index: 1, kind: input, shape index: {}]   ;;  %s5067_s2 = inlined_call_operand.hbm [shape: bf16[1,512], index: 2, kind: input, shape index: {}]   ;;  %s5068_s3 = inlined_call_operand.hbm [shape: bf16[512,512], index: 3, kind: input, shape index: {}]   ;;  %s5069_s4 = inlined_call_operand.vmem [shape: bf16[1,512], index: 4, kind: input, shape index: {}]   ;;  %s5070_s5 = inlined_call_operand.hbm [shape: f32[1,512], index: 5, kind: input, shape index: {}]   ;;  %s5071_s6 = inlined_call_operand.<no memory space> [shape: f32[1,1], index: 6, kind: input, shape index: {}]   ;;  %s5072_s7 = inlined_call_operand.vmem [shape: f32[8,1], index: 7, kind: output, shape index: {}]  }
   0x1   :  { %v12_v0 = vstv %s5071_s6 }
   0x2   :  { %13 = vst [vmem:[#allocation2] sm:$0x1] %v12_v0 }
   0x3   :  { %14 = vsyncpa [#allocation4], 0 }
   0x4   :  { %15 = vsyncpa [#allocation6], 0  ;;  %s32_s28 = sshll.u32 %s5066_s1, 4  ;;  %s33_s28 = int_to_ptr.hbm [resolvable:$true] %s32_s28 }
   0x5   :  { %16 = vsyncpa [#allocation9], 0  ;;  %s4880_s29 = smov [#allocation5]   ;;  %s56_s10 = sshll.u32 %s5068_s3, 4  ;;  %s57_s10 = int_to_ptr.hbm [resolvable:$true] %s56_s10 }
   0x6   :  { %s34_s30 = sshll.u32 %s4880_s29, 4  ;;  %s4881_s11 = smov 256   ;;  %s35_s30 = int_to_ptr.vmem [resolvable:$true] %s34_s30 }
   0x7   :  { %s4882_s12 = smov 16   ;;  %s4883_s6 = smov [#allocation8]  }
   0x8   :  { %40 = dma.hbm_to_vmem [thread:$0]  %s33_s28, 28672, %s35_s30, [#allocation6], %s4881_s11, %s4881_s11, %s4882_s12  }
   0x9   :  { %s58_s13 = sshll.u32 %s4883_s6, 4  ;;  %s22_s16 = sshll.u32 %s5065_s0, 4  ;;  %s59_s13 = int_to_ptr.vmem [resolvable:$true] %s58_s13  ;;  %s23_s16 = int_to_ptr.hbm [resolvable:$true] %s22_s16 }
   0xa   :  { %64 = dma.hbm_to_vmem [thread:$0]  %s57_s10, 16384, %s59_s13, [#allocation9], %s4881_s11, %s4881_s11, %s4882_s12  }
   0xb   :  { %s46_s18 = sshll.u32 %s5067_s2, 4  ;;  %s4884_s19 = smov [#allocation3]   ;;  %s47_s18 = int_to_ptr.hbm [resolvable:$true] %s46_s18 }
   0xc   :  { %s24_s20 = sshll.u32 %s4884_s19, 4  ;;  %s4885_s3 = smov [#allocation7]   ;;  %s25_s20 = int_to_ptr.vmem [resolvable:$true] %s24_s20 }
   0xd   :  { %27 = dma.hbm_to_vmem [thread:$0]  %s23_s16, 448, %s25_s20, [#allocation4]  }
   0xe   :  { %s48_s21 = sshll.u32 %s4885_s3, 4  ;;  %s72_s24 = sshll.u32 %s5070_s5, 4  ;;  %s49_s21 = int_to_ptr.vmem [resolvable:$true] %s48_s21  ;;  %s73_s24 = int_to_ptr.hbm [resolvable:$true] %s72_s24 }
   0xf   :  { %51 = dma.hbm_to_vmem [thread:$0]  %s47_s18, 64, %s49_s21, [#allocation6]  }
  0x10   :  { %s4886_s0 = smov [#allocation10]  }
  0x11   :  { %s74_s25 = sshll.u32 %s4886_s0, 4  ;;  %s75_s25 = int_to_ptr.vmem [resolvable:$true] %s74_s25 }
  0x12   :  { %77 = dma.hbm_to_vmem [thread:$0]  %s73_s24, 64, %s75_s25, [#allocation9]  }
  0x13   :  { %4874 = dma.done.wait [#allocation4], 448  }
  0x14   :  { %4875 = vsyncadd [#allocation4], 4294966848 }
  0x15   :  { %4876 = dma.done.wait [#allocation6], 28736  }
  0x16   :  { %4877 = vsyncadd [#allocation6], 4294938560 }
  0x17   :  { %4878 = dma.done.wait [#allocation9], 16448  }
  0x18   :  { %4879 = vsyncadd [#allocation9], 4294950848  ;;  %v3095_v1 = vld [vmem:[#allocation5 + $0xe0] sm:$0xf]  ;;  %v4420_v2 = vld [vmem:[#allocation5 + $0xec] sm:$0xf0] }
  0x19   :  { %v3223_v3 = vld [vmem:[#allocation5 + $0x1e0] sm:$0xf]  ;;  %v3096_v4 = vor.u32 %v4420_v2, %v3095_v1  ;;  %v4452_v5 = vld [vmem:[#allocation5 + $0x1ec] sm:$0xf0]  ;;  %vm2972_vm3 = vcmask 7168  }
  0x1a   :  { %v3351_v6 = vld [vmem:[#allocation5 + $0x2e0] sm:$0xf]  ;;  %v4484_v7 = vld [vmem:[#allocation5 + $0x2ec] sm:$0xf0]  ;;  %v3224_v8 = vor.u32 %v4452_v5, %v3223_v3 }
  0x1b   :  { %v3352_v9 = vor.u32 %v4484_v7, %v3351_v6  ;;  %v3479_v10 = vld [vmem:[#allocation5 + $0x3e0] sm:$0xf]  ;;  %v4516_v11 = vld [vmem:[#allocation5 + $0x3ec] sm:$0xf0]  ;;  %1473 = vmatpush.bf16.msra.mxu0 %v3096_v4 }
  0x1c   :  { %v3079_v12 = vld [vmem:[#allocation5 + $0xc0] sm:$0xf]  ;;  %v3480_v13 = vor.u32 %v4516_v11, %v3479_v10  ;;  %v4416_v14 = vld [vmem:[#allocation5 + $0xcc] sm:$0xf0]  ;;  %1486 = vmatpush.bf16.msra.mxu1 %v3224_v8 }
  0x1d   :  { %v3207_v15 = vld [vmem:[#allocation5 + $0x1c0] sm:$0xf]  ;;  %v4448_v16 = vld [vmem:[#allocation5 + $0x1cc] sm:$0xf0]  ;;  %1499 = vmatpush.bf16.msra.mxu2 %v3352_v9  ;;  %v3080_v17 = vor.u32 %v4416_v14, %v3079_v12 }
  0x1e   :  { %v3208_v18 = vor.u32 %v4448_v16, %v3207_v15  ;;  %v3335_v19 = vld [vmem:[#allocation5 + $0x2c0] sm:$0xf]  ;;  %v4480_v20 = vld [vmem:[#allocation5 + $0x2cc] sm:$0xf0]  ;;  %1512 = vmatpush.bf16.msra.mxu3 %v3480_v13 }
  0x1f   :  { %v3463_v21 = vld [vmem:[#allocation5 + $0x3c0] sm:$0xf]  ;;  %v3336_v22 = vor.u32 %v4480_v20, %v3335_v19  ;;  %v4512_v23 = vld [vmem:[#allocation5 + $0x3cc] sm:$0xf0]  ;;  %1474 = vmatpush.bf16.msra.mxu0 %v3080_v17 }
  0x20   :  { %v3063_v24 = vld [vmem:[#allocation5 + $0xa0] sm:$0xf]  ;;  %v4412_v25 = vld [vmem:[#allocation5 + $0xac] sm:$0xf0]  ;;  %v3464_v26 = vor.u32 %v4512_v23, %v3463_v21  ;;  %1487 = vmatpush.bf16.msra.mxu1 %v3208_v18 }
  0x21   :  { %v3191_v27 = vld [vmem:[#allocation5 + $0x1a0] sm:$0xf]  ;;  %v4444_v28 = vld [vmem:[#allocation5 + $0x1ac] sm:$0xf0]  ;;  %v3064_v30 = vor.u32 %v4412_v25, %v3063_v24  ;;  %1500 = vmatpush.bf16.msra.mxu2 %v3336_v22 }
  0x22   :  { %v3319_v29 = vld [vmem:[#allocation5 + $0x2a0] sm:$0xf]  ;;  %v4476_v31 = vld [vmem:[#allocation5 + $0x2ac] sm:$0xf0]  ;;  %v3192_v34 = vor.u32 %v4444_v28, %v3191_v27  ;;  %1513 = vmatpush.bf16.msra.mxu3 %v3464_v26 }
  0x23   :  { %v3447_v32 = vld [vmem:[#allocation5 + $0x3a0] sm:$0xf]  ;;  %v4508_v33 = vld [vmem:[#allocation5 + $0x3ac] sm:$0xf0]  ;;  %v3320_v35 = vor.u32 %v4476_v31, %v3319_v29  ;;  %1475 = vmatpush.bf16.msra.mxu0 %v3064_v30 }
  0x24   :  { %v3047_v36 = vld [vmem:[#allocation5 + $0x80] sm:$0xf]  ;;  %v4408_v37 = vld [vmem:[#allocation5 + $0x8c] sm:$0xf0]  ;;  %v3448_v39 = vor.u32 %v4508_v33, %v3447_v32  ;;  %1488 = vmatpush.bf16.msra.mxu1 %v3192_v34 }
  0x25   :  { %v3175_v38 = vld [vmem:[#allocation5 + $0x180] sm:$0xf]  ;;  %v4440_v40 = vld [vmem:[#allocation5 + $0x18c] sm:$0xf0]  ;;  %v3048_v45 = vor.u32 %v4408_v37, %v3047_v36  ;;  %1501 = vmatpush.bf16.msra.mxu2 %v3320_v35 }
  0x26   :  { %v3303_v41 = vld [vmem:[#allocation5 + $0x280] sm:$0xf]  ;;  %v4472_v42 = vld [vmem:[#allocation5 + $0x28c] sm:$0xf0]  ;;  %v3176_v46 = vor.u32 %v4440_v40, %v3175_v38  ;;  %1514 = vmatpush.bf16.msra.mxu3 %v3448_v39  ;;  %v4418_v38 = vld [vmem:[#allocation5 + $0xe4] sm:$0xf] }
  0x27   :  { %v3431_v43 = vld [vmem:[#allocation5 + $0x380] sm:$0xf]  ;;  %v4504_v44 = vld [vmem:[#allocation5 + $0x38c] sm:$0xf0]  ;;  %v3304_v47 = vor.u32 %v4472_v42, %v3303_v41  ;;  %1476 = vmatpush.bf16.msra.mxu0 %v3048_v45  ;;  %v3097_v39 = vld [vmem:[#allocation5 + $0xf0] sm:$0xf0] }
  0x28   :  { %v3031_v48 = vld [vmem:[#allocation5 + $0x60] sm:$0xf]  ;;  %v4404_v49 = vld [vmem:[#allocation5 + $0x6c] sm:$0xf0]  ;;  %v3432_v51 = vor.u32 %v4504_v44, %v3431_v43  ;;  %1489 = vmatpush.bf16.msra.mxu1 %v3176_v46 }
  0x29   :  { %v3159_v50 = vld [vmem:[#allocation5 + $0x160] sm:$0xf]  ;;  %v4436_v52 = vld [vmem:[#allocation5 + $0x16c] sm:$0xf0]  ;;  %v3032_v57 = vor.u32 %v4404_v49, %v3031_v48  ;;  %1502 = vmatpush.bf16.msra.mxu2 %v3304_v47  ;;  %v3100_v47 = vor.u32 %v4418_v38, %v3097_v39 }
  0x2a   :  { %v3287_v53 = vld [vmem:[#allocation5 + $0x260] sm:$0xf]  ;;  %v4468_v54 = vld [vmem:[#allocation5 + $0x26c] sm:$0xf0]  ;;  %v3160_v58 = vor.u32 %v4436_v52, %v3159_v50  ;;  %1515 = vmatpush.bf16.msra.mxu3 %v3432_v51  ;;  %v4414_v51 = vld [vmem:[#allocation5 + $0xc4] sm:$0xf] }
  0x2b   :  { %v3415_v55 = vld [vmem:[#allocation5 + $0x360] sm:$0xf]  ;;  %v4500_v56 = vld [vmem:[#allocation5 + $0x36c] sm:$0xf0]  ;;  %v3288_v59 = vor.u32 %v4468_v54, %v3287_v53  ;;  %1477 = vmatpush.bf16.msra.mxu0 %v3032_v57  ;;  %v3081_v52 = vld [vmem:[#allocation5 + $0xd0] sm:$0xf0] }
  0x2c   :  { %v3015_v60 = vld [vmem:[#allocation5 + $0x40] sm:$0xf]  ;;  %v4400_v61 = vld [vmem:[#allocation5 + $0x4c] sm:$0xf0]  ;;  %v3416_v63 = vor.u32 %v4500_v56, %v3415_v55  ;;  %1490 = vmatpush.bf16.msra.mxu1 %v3160_v58 }
  0x2d   :  { %v3143_v62 = vld [vmem:[#allocation5 + $0x140] sm:$0xf]  ;;  %v4432_v0 = vld [vmem:[#allocation5 + $0x14c] sm:$0xf0]  ;;  %v3016_v5 = vor.u32 %v4400_v61, %v3015_v60  ;;  %1503 = vmatpush.bf16.msra.mxu2 %v3288_v59  ;;  %v3084_v60 = vor.u32 %v4414_v51, %v3081_v52 }
  0x2e   :  { %v3271_v1 = vld [vmem:[#allocation5 + $0x240] sm:$0xf]  ;;  %v4464_v2 = vld [vmem:[#allocation5 + $0x24c] sm:$0xf0]  ;;  %v3144_v6 = vor.u32 %v4432_v0, %v3143_v62  ;;  %1516 = vmatpush.bf16.msra.mxu3 %v3416_v63 }
  0x2f   :  { %v3399_v3 = vld [vmem:[#allocation5 + $0x340] sm:$0xf]  ;;  %v4496_v4 = vld [vmem:[#allocation5 + $0x34c] sm:$0xf0]  ;;  %v3272_v7 = vor.u32 %v4464_v2, %v3271_v1  ;;  %1478 = vmatpush.bf16.msra.mxu0 %v3016_v5  ;;  %v4410_v2 = vld [vmem:[#allocation5 + $0xa4] sm:$0xf] }
  0x30   :  { %v2999_v8 = vld [vmem:[#allocation5 + $0x20] sm:$0xf]  ;;  %v4396_v9 = vld [vmem:[#allocation5 + $0x2c] sm:$0xf0]  ;;  %v3400_v11 = vor.u32 %v4496_v4, %v3399_v3  ;;  %1491 = vmatpush.bf16.msra.mxu1 %v3144_v6  ;;  %v3065_v3 = vld [vmem:[#allocation5 + $0xb0] sm:$0xf0] }
  0x31   :  { %v3127_v10 = vld [vmem:[#allocation5 + $0x120] sm:$0xf]  ;;  %v4428_v12 = vld [vmem:[#allocation5 + $0x12c] sm:$0xf0]  ;;  %v3000_v17 = vor.u32 %v4396_v9, %v2999_v8  ;;  %1504 = vmatpush.bf16.msra.mxu2 %v3272_v7  ;;  %v100_v6 = vld [vmem:[#allocation3] sm:$0xff] }
  0x32   :  { %v3255_v13 = vld [vmem:[#allocation5 + $0x220] sm:$0xf]  ;;  %v4460_v14 = vld [vmem:[#allocation5 + $0x22c] sm:$0xf0]  ;;  %v3128_v20 = vor.u32 %v4428_v12, %v3127_v10  ;;  %1517 = vmatpush.bf16.msra.mxu3 %v3400_v11 }
  0x33   :  { %v3383_v15 = vld [vmem:[#allocation5 + $0x320] sm:$0xf]  ;;  %v4492_v16 = vld [vmem:[#allocation5 + $0x32c] sm:$0xf0]  ;;  %v3256_v21 = vor.u32 %v4460_v14, %v3255_v13  ;;  %1479 = vmatpush.bf16.msra.mxu0 %v3000_v17  ;;  %v332_v13 = vunpack.c.l.b16 %v100_v6  ;;  %v333_v14 = vunpack.c.h.b16 %v100_v6 }
  0x34   :  { %v2983_v18 = vld [vmem:[#allocation5] sm:$0xf]  ;;  %v4392_v19 = vld [vmem:[#allocation5 + $0xc] sm:$0xf0]  ;;  %v3384_v25 = vor.u32 %v4492_v16, %v3383_v15  ;;  %1492 = vmatpush.bf16.msra.mxu1 %v3128_v20  ;;  %v3068_v15 = vor.u32 %v4410_v2, %v3065_v3  ;;  %v3049_v20 = vld [vmem:[#allocation5 + $0x90] sm:$0xf0] }
  0x35   :  { %v3111_v22 = vld [vmem:[#allocation5 + $0x100] sm:$0xf]  ;;  %v4424_v23 = vld [vmem:[#allocation5 + $0x10c] sm:$0xf0]  ;;  %v2984_v32 = vor.u32 %v4392_v19, %v2983_v18  ;;  %1505 = vmatpush.bf16.msra.mxu2 %v3256_v21  ;;  %v4406_v19 = vld [vmem:[#allocation5 + $0x84] sm:$0xf]  ;;  %v4950_v21 = vpack.c.b16 %v332_v13, %v332_v13 }
  0x36   :  { %v3239_v24 = vld [vmem:[#allocation5 + $0x200] sm:$0xf]  ;;  %v4456_v26 = vld [vmem:[#allocation5 + $0x20c] sm:$0xf0]  ;;  %v3112_v36 = vor.u32 %v4424_v23, %v3111_v22  ;;  %1518 = vmatpush.bf16.msra.mxu3 %v3384_v25  ;;  %v4952_v22 = vpack.c.b16 %v333_v14, %v333_v14  ;;  %v4482_v13 = vld [vmem:[#allocation5 + $0x2e4] sm:$0xf] }
  0x37   :  { %v3367_v27 = vld [vmem:[#allocation5 + $0x300] sm:$0xf]  ;;  %v4488_v28 = vld [vmem:[#allocation5 + $0x30c] sm:$0xf0]  ;;  %v3240_v37 = vor.u32 %v4456_v26, %v3239_v24  ;;  %1480 = vmatpush.bf16.msra.mxu0 %v2984_v32 }
  0x38   :  { %v3607_v29 = vld [vmem:[#allocation5 + $0x4e0] sm:$0xf]  ;;  %v4548_v30 = vld [vmem:[#allocation5 + $0x4ec] sm:$0xf0]  ;;  %v3368_v40 = vor.u32 %v4488_v28, %v3367_v27  ;;  %1493 = vmatpush.bf16.msra.mxu1 %v3112_v36 }
  0x39   :  { %v3735_v31 = vld [vmem:[#allocation5 + $0x5e0] sm:$0xf]  ;;  %v4580_v33 = vld [vmem:[#allocation5 + $0x5ec] sm:$0xf0]  ;;  %v3608_v41 = vor.u32 %v4548_v30, %v3607_v29  ;;  %1506 = vmatpush.bf16.msra.mxu2 %v3240_v37  ;;  %v3052_v29 = vor.u32 %v4406_v19, %v3049_v20 }
  0x3a   :  { %v3863_v34 = vld [vmem:[#allocation5 + $0x6e0] sm:$0xf]  ;;  %v4612_v35 = vld [vmem:[#allocation5 + $0x6ec] sm:$0xf0]  ;;  %v3736_v42 = vor.u32 %v4580_v33, %v3735_v31  ;;  %1519 = vmatpush.bf16.msra.mxu3 %v3368_v40  ;;  %1481 = vmatmul.bf16.vlgmr.msra.gmra.mxu0 %v4950_v21  ;;  %v4402_v33 = vld [vmem:[#allocation5 + $0x64] sm:$0xf] }
  0x3b   :  { %v3864_v43 = vor.u32 %v4612_v35, %v3863_v34  ;;  %v3591_v44 = vld [vmem:[#allocation5 + $0x4c0] sm:$0xf]  ;;  %v4544_v45 = vld [vmem:[#allocation5 + $0x4cc] sm:$0xf0]  ;;  %1525 = vmatpush.bf16.msrb.mxu0 %v3608_v41  ;;  %v3033_v34 = vld [vmem:[#allocation5 + $0x70] sm:$0xf0]  ;;  %1494 = vmatmul.bf16.vlgmr.msra.gmra.mxu1 %v4952_v22 }
  0x3c   :  { %v3719_v46 = vld [vmem:[#allocation5 + $0x5c0] sm:$0xf]  ;;  %v4576_v48 = vld [vmem:[#allocation5 + $0x5cc] sm:$0xf0]  ;;  %v3592_v53 = vor.u32 %v4544_v45, %v3591_v44  ;;  %1538 = vmatpush.bf16.msrb.mxu1 %v3736_v42  ;;  %v3036_v41 = vor.u32 %v4402_v33, %v3033_v34  ;;  %v4398_v45 = vld [vmem:[#allocation5 + $0x44] sm:$0xf] }
  0x3d   :  { %v3847_v49 = vld [vmem:[#allocation5 + $0x6c0] sm:$0xf]  ;;  %v4608_v50 = vld [vmem:[#allocation5 + $0x6cc] sm:$0xf0]  ;;  %1551 = vmatpush.bf16.msrb.mxu2 %v3864_v43  ;;  %v3720_v55 = vor.u32 %v4576_v48, %v3719_v46  ;;  %v3017_v46 = vld [vmem:[#allocation5 + $0x50] sm:$0xf0] }
  0x3e   :  { %v3575_v54 = vld [vmem:[#allocation5 + $0x4a0] sm:$0xf]  ;;  %v3848_v56 = vor.u32 %v4608_v50, %v3847_v49  ;;  %v4540_v57 = vld [vmem:[#allocation5 + $0x4ac] sm:$0xf0]  ;;  %1564 = vmatpush.bf16.msrb.mxu3 %v3100_v47  ;;  %v4478_v33 = vld [vmem:[#allocation5 + $0x2c4] sm:$0xf] }
  0x3f   :  { %v3703_v58 = vld [vmem:[#allocation5 + $0x5a0] sm:$0xf]  ;;  %v101_v59 = vld [vmem:[#allocation3 + $0x8] sm:$0xff]  ;;  %1526 = vmatpush.bf16.msrb.mxu0 %v3592_v53  ;;  %v3576_v4 = vor.u32 %v4540_v57, %v3575_v54  ;;  %v3020_v53 = vor.u32 %v4398_v45, %v3017_v46  ;;  %v4394_v57 = vld [vmem:[#allocation5 + $0x24] sm:$0xf] }
  0x40   :  { %v4572_v61 = vld [vmem:[#allocation5 + $0x5ac] sm:$0xf0]  ;;  %v3831_v62 = vld [vmem:[#allocation5 + $0x6a0] sm:$0xf]  ;;  %v334_v0 = vunpack.c.l.b16 %v101_v59  ;;  %v335_v1 = vunpack.c.h.b16 %v101_v59  ;;  %1539 = vmatpush.bf16.msrb.mxu1 %v3720_v55  ;;  %v4442_v46 = vld [vmem:[#allocation5 + $0x1a4] sm:$0xf] }
  0x41   :  { %v4604_v63 = vld [vmem:[#allocation5 + $0x6ac] sm:$0xf0]  ;;  %1552 = vmatpush.bf16.msrb.mxu2 %v3848_v56  ;;  %v3704_v8 = vor.u32 %v4572_v61, %v3703_v58  ;;  %v3559_v10 = vld [vmem:[#allocation5 + $0x480] sm:$0xf]  ;;  %v3001_v58 = vld [vmem:[#allocation5 + $0x30] sm:$0xf0] }
  0x42   :  { %v4945_v5 = vpack.c.b16 %v334_v0, %v334_v0  ;;  %v4947_v7 = vpack.c.b16 %v335_v1, %v335_v1  ;;  %v3832_v9 = vor.u32 %v4604_v63, %v3831_v62  ;;  %v4536_v11 = vld [vmem:[#allocation5 + $0x48c] sm:$0xf0]  ;;  %v3687_v12 = vld [vmem:[#allocation5 + $0x580] sm:$0xf]  ;;  %1565 = vmatpush.bf16.msrb.mxu3 %v3084_v60  ;;  %v3004_v6 = vor.u32 %v4394_v57, %v3001_v58  ;;  %v4438_v58 = vld [vmem:[#allocation5 + $0x184] sm:$0xf] }
  0x43   :  { %v4568_v16 = vld [vmem:[#allocation5 + $0x58c] sm:$0xf0]  ;;  %v3815_v17 = vld [vmem:[#allocation5 + $0x680] sm:$0xf]  ;;  %1527 = vmatpush.bf16.msrb.mxu0 %v3576_v4  ;;  %v3560_v23 = vor.u32 %v4536_v11, %v3559_v10  ;;  %v103_v4 = vld [vmem:[#allocation3 + $0x18] sm:$0xf] }
  0x44   :  { %v4600_v18 = vld [vmem:[#allocation5 + $0x68c] sm:$0xf0]  ;;  %1507 = vmatmul.bf16.vlgmr.msra.gmra.mxu2 %v4945_v5  ;;  %1520 = vmatmul.bf16.vlgmr.msra.gmra.mxu3 %v4947_v7  ;;  %v3688_v24 = vor.u32 %v4568_v16, %v3687_v12  ;;  %v3543_v26 = vld [vmem:[#allocation5 + $0x460] sm:$0xf]  ;;  %v102_v10 = vld [vmem:[#allocation3 + $0x10] sm:$0xff] }
  0x45   :  { %1540 = vmatpush.bf16.msrb.mxu1 %v3704_v8  ;;  %1553 = vmatpush.bf16.msrb.mxu2 %v3832_v9  ;;  %v3816_v25 = vor.u32 %v4600_v18, %v3815_v17  ;;  %v4532_v27 = vld [vmem:[#allocation5 + $0x46c] sm:$0xf0]  ;;  %v3671_v28 = vld [vmem:[#allocation5 + $0x560] sm:$0xf]  ;;  %v4390_v8 = vld [vmem:[#allocation5 + $0x4] sm:$0xf]  ;;  %v338_v18 = vunpack.c.l.b16 %v103_v4 }
  0x46   :  { %1566 = vmatpush.bf16.msrb.mxu3 %v3068_v15  ;;  %v4564_v30 = vld [vmem:[#allocation5 + $0x56c] sm:$0xf0]  ;;  %v3799_v31 = vld [vmem:[#allocation5 + $0x660] sm:$0xf]  ;;  %v3544_v35 = vor.u32 %v4532_v27, %v3543_v26  ;;  %v2985_v9 = vld [vmem:[#allocation5 + $0x10] sm:$0xf0]  ;;  %v337_v26 = vunpack.c.h.b16 %v102_v10 }
  0x47   :  { %v4596_v32 = vld [vmem:[#allocation5 + $0x66c] sm:$0xf0]  ;;  %1528 = vmatpush.bf16.msrb.mxu0 %v3560_v23  ;;  %v3672_v36 = vor.u32 %v4564_v30, %v3671_v28  ;;  %v3527_v38 = vld [vmem:[#allocation5 + $0x440] sm:$0xf]  ;;  %v4450_v11 = vld [vmem:[#allocation5 + $0x1e4] sm:$0xf]  ;;  %v2988_v27 = vor.u32 %v4390_v8, %v2985_v9 }
  0x48   :  { %v3800_v37 = vor.u32 %v4596_v32, %v3799_v31  ;;  %v4528_v39 = vld [vmem:[#allocation5 + $0x44c] sm:$0xf0]  ;;  %v3655_v40 = vld [vmem:[#allocation5 + $0x540] sm:$0xf]  ;;  %v3225_v12 = vld [vmem:[#allocation5 + $0x1f0] sm:$0xf0] }
  0x49   :  { %1541 = vmatpush.bf16.msrb.mxu1 %v3688_v24  ;;  %1554 = vmatpush.bf16.msrb.mxu2 %v3816_v25  ;;  %v4560_v42 = vld [vmem:[#allocation5 + $0x54c] sm:$0xf0]  ;;  %v3783_v43 = vld [vmem:[#allocation5 + $0x640] sm:$0xf]  ;;  %v3528_v47 = vor.u32 %v4528_v39, %v3527_v38  ;;  %v3353_v15 = vld [vmem:[#allocation5 + $0x2f0] sm:$0xf0]  ;;  %v336_v25 = vunpack.c.l.b16 %v102_v10  ;;  %v3228_v28 = vor.u32 %v4450_v11, %v3225_v12  ;;  %v4957_v38 = vpack.c.b16 %v338_v18, %v338_v18 }
  0x4a   :  { %1567 = vmatpush.bf16.msrb.mxu3 %v3052_v29  ;;  %v4592_v44 = vld [vmem:[#allocation5 + $0x64c] sm:$0xf0]  ;;  %v3656_v48 = vor.u32 %v4560_v42, %v3655_v40  ;;  %v3511_v50 = vld [vmem:[#allocation5 + $0x420] sm:$0xf]  ;;  %v4514_v16 = vld [vmem:[#allocation5 + $0x3e4] sm:$0xf]  ;;  %v3356_v29 = vor.u32 %v4482_v13, %v3353_v15  ;;  %v4961_v42 = vpack.c.b16 %v337_v26, %v337_v26 }
  0x4b   :  { %1529 = vmatpush.bf16.msrb.mxu0 %v3544_v35  ;;  %v3784_v49 = vor.u32 %v4592_v44, %v3783_v43  ;;  %v4524_v51 = vld [vmem:[#allocation5 + $0x42c] sm:$0xf0]  ;;  %v3639_v52 = vld [vmem:[#allocation5 + $0x520] sm:$0xf]  ;;  %v3481_v17 = vld [vmem:[#allocation5 + $0x3f0] sm:$0xf0] }
  0x4c   :  { %v4556_v54 = vld [vmem:[#allocation5 + $0x52c] sm:$0xf0]  ;;  %v3767_v55 = vld [vmem:[#allocation5 + $0x620] sm:$0xf]  ;;  %v3512_v60 = vor.u32 %v4524_v51, %v3511_v50  ;;  %v4546_v23 = vld [vmem:[#allocation5 + $0x4e4] sm:$0xf]  ;;  %v3484_v30 = vor.u32 %v4514_v16, %v3481_v17 }
  0x4d   :  { %1542 = vmatpush.bf16.msrb.mxu1 %v3672_v36  ;;  %1555 = vmatpush.bf16.msrb.mxu2 %v3800_v37  ;;  %v4588_v56 = vld [vmem:[#allocation5 + $0x62c] sm:$0xf0]  ;;  %v3495_v59 = vld [vmem:[#allocation5 + $0x400] sm:$0xf]  ;;  %v3640_v0 = vor.u32 %v4556_v54, %v3639_v52  ;;  %v3609_v24 = vld [vmem:[#allocation5 + $0x4f0] sm:$0xf0] }
  0x4e   :  { %1568 = vmatpush.bf16.msrb.mxu3 %v3036_v41  ;;  %v4520_v61 = vld [vmem:[#allocation5 + $0x40c] sm:$0xf0]  ;;  %v3623_v62 = vld [vmem:[#allocation5 + $0x500] sm:$0xf]  ;;  %v3768_v1 = vor.u32 %v4588_v56, %v3767_v55  ;;  %v4446_v31 = vld [vmem:[#allocation5 + $0x1c4] sm:$0xf]  ;;  %v3612_v34 = vor.u32 %v4546_v23, %v3609_v24  ;;  %v4959_v41 = vpack.c.b16 %v336_v25, %v336_v25 }
  0x4f   :  { %1530 = vmatpush.bf16.msrb.mxu0 %v3528_v47  ;;  %v4552_v63 = vld [vmem:[#allocation5 + $0x50c] sm:$0xf0]  ;;  %v3751_v2 = vld [vmem:[#allocation5 + $0x600] sm:$0xf]  ;;  %v3496_v14 = vor.u32 %v4520_v61, %v3495_v59  ;;  %v3209_v32 = vld [vmem:[#allocation5 + $0x1d0] sm:$0xf0] }
  0x50   :  { %v4584_v3 = vld [vmem:[#allocation5 + $0x60c] sm:$0xf0]  ;;  %v3624_v19 = vor.u32 %v4552_v63, %v3623_v62  ;;  %v3337_v35 = vld [vmem:[#allocation5 + $0x2d0] sm:$0xf0]  ;;  %v4510_v36 = vld [vmem:[#allocation5 + $0x3c4] sm:$0xf]  ;;  %v3212_v43 = vor.u32 %v4446_v31, %v3209_v32 }
  0x51   :  { %1543 = vmatpush.bf16.msrb.mxu1 %v3656_v48  ;;  %1556 = vmatpush.bf16.msrb.mxu2 %v3784_v49  ;;  %v3752_v20 = vor.u32 %v4584_v3, %v3751_v2  ;;  %v3465_v37 = vld [vmem:[#allocation5 + $0x3d0] sm:$0xf0]  ;;  %v4542_v39 = vld [vmem:[#allocation5 + $0x4c4] sm:$0xf]  ;;  %v3340_v44 = vor.u32 %v4478_v33, %v3337_v35 }
  0x52   :  { %1569 = vmatpush.bf16.msrb.mxu3 %v3020_v53  ;;  %v3593_v40 = vld [vmem:[#allocation5 + $0x4d0] sm:$0xf0]  ;;  %v3468_v45 = vor.u32 %v4510_v36, %v3465_v37  ;;  %v4474_v48 = vld [vmem:[#allocation5 + $0x2a4] sm:$0xf] }
  0x53   :  { %1531 = vmatpush.bf16.msrb.mxu0 %v3512_v60  ;;  %v3193_v47 = vld [vmem:[#allocation5 + $0x1b0] sm:$0xf0]  ;;  %v3596_v49 = vor.u32 %v4542_v39, %v3593_v40  ;;  %v4506_v51 = vld [vmem:[#allocation5 + $0x3a4] sm:$0xf] }
  0x54   :  { %v3321_v50 = vld [vmem:[#allocation5 + $0x2b0] sm:$0xf0]  ;;  %v4538_v53 = vld [vmem:[#allocation5 + $0x4a4] sm:$0xf]  ;;  %v3196_v55 = vor.u32 %v4442_v46, %v3193_v47 }
  0x55   :  { %1544 = vmatpush.bf16.msrb.mxu1 %v3640_v0  ;;  %1557 = vmatpush.bf16.msrb.mxu2 %v3768_v1  ;;  %v3449_v52 = vld [vmem:[#allocation5 + $0x3b0] sm:$0xf0]  ;;  %v3324_v56 = vor.u32 %v4474_v48, %v3321_v50  ;;  %v4470_v60 = vld [vmem:[#allocation5 + $0x284] sm:$0xf] }
  0x56   :  { %1570 = vmatpush.bf16.msrb.mxu3 %v3004_v6  ;;  %v3577_v54 = vld [vmem:[#allocation5 + $0x4b0] sm:$0xf0]  ;;  %v3452_v57 = vor.u32 %v4506_v51, %v3449_v52  ;;  %v4502_v63 = vld [vmem:[#allocation5 + $0x384] sm:$0xf] }
  0x57   :  { %1532 = vmatpush.bf16.msrb.mxu0 %v3496_v14  ;;  %v3177_v59 = vld [vmem:[#allocation5 + $0x190] sm:$0xf0]  ;;  %v3580_v61 = vor.u32 %v4538_v53, %v3577_v54  ;;  %v4534_v1 = vld [vmem:[#allocation5 + $0x484] sm:$0xf] }
  0x58   :  { %v3305_v62 = vld [vmem:[#allocation5 + $0x290] sm:$0xf0]  ;;  %v3180_v3 = vor.u32 %v4438_v58, %v3177_v59  ;;  %v4434_v8 = vld [vmem:[#allocation5 + $0x164] sm:$0xf] }
  0x59   :  { %1545 = vmatpush.bf16.msrb.mxu1 %v3624_v19  ;;  %1558 = vmatpush.bf16.msrb.mxu2 %v3752_v20  ;;  %v3433_v0 = vld [vmem:[#allocation5 + $0x390] sm:$0xf0]  ;;  %v3308_v4 = vor.u32 %v4470_v60, %v3305_v62  ;;  %v4466_v10 = vld [vmem:[#allocation5 + $0x264] sm:$0xf] }
  0x5a   :  { %1571 = vmatpush.bf16.msrb.mxu3 %v2988_v27  ;;  %1533 = vmatmul.bf16.vlgmr.msrb.gmra.mxu0 %v4959_v41  ;;  %v3561_v2 = vld [vmem:[#allocation5 + $0x490] sm:$0xf0]  ;;  %v3436_v6 = vor.u32 %v4502_v63, %v3433_v0  ;;  %v4498_v13 = vld [vmem:[#allocation5 + $0x364] sm:$0xf]  ;;  %v3103_v63 = vld [vmem:[#allocation5 + $0xe8] sm:$0xf] }
  0x5b   :  { %1577 = vmatpush.bf16.msra.mxu0 %v3228_v28  ;;  %v3161_v9 = vld [vmem:[#allocation5 + $0x170] sm:$0xf0]  ;;  %v3564_v11 = vor.u32 %v4534_v1, %v3561_v2  ;;  %v4530_v15 = vld [vmem:[#allocation5 + $0x464] sm:$0xf]  ;;  %v4421_v0 = vld [vmem:[#allocation5 + $0xf4] sm:$0xf0] }
  0x5c   :  { %1559 = vmatmul.bf16.vlgmr.msrb.gmra.mxu2 %v4957_v38  ;;  %1546 = vmatmul.bf16.vlgmr.msrb.gmra.mxu1 %v4961_v42  ;;  %v3289_v12 = vld [vmem:[#allocation5 + $0x270] sm:$0xf0]  ;;  %v3164_v17 = vor.u32 %v4434_v8, %v3161_v9  ;;  %v4430_v20 = vld [vmem:[#allocation5 + $0x144] sm:$0xf] }
  0x5d   :  { %1590 = vmatpush.bf16.msra.mxu1 %v3356_v29  ;;  %1603 = vmatpush.bf16.msra.mxu2 %v3484_v30  ;;  %v3417_v14 = vld [vmem:[#allocation5 + $0x370] sm:$0xf0]  ;;  %v3292_v18 = vor.u32 %v4466_v10, %v3289_v12  ;;  %v4462_v24 = vld [vmem:[#allocation5 + $0x244] sm:$0xf]  ;;  %v3104_v10 = vor.u32 %v4421_v0, %v3103_v63 }
  0x5e   :  { %1616 = vmatpush.bf16.msra.mxu3 %v3612_v34  ;;  %v3545_v16 = vld [vmem:[#allocation5 + $0x470] sm:$0xf0]  ;;  %v3420_v19 = vor.u32 %v4498_v13, %v3417_v14  ;;  %v4494_v27 = vld [vmem:[#allocation5 + $0x344] sm:$0xf] }
  0x5f   :  { %1578 = vmatpush.bf16.msra.mxu0 %v3212_v43  ;;  %1572 = vmatmul.bf16.vlgmr.msrb.gmra.mxu3 %v4950_v21  ;;  %v3145_v23 = vld [vmem:[#allocation5 + $0x150] sm:$0xf0]  ;;  %v3548_v25 = vor.u32 %v4530_v15, %v3545_v16  ;;  %v4526_v29 = vld [vmem:[#allocation5 + $0x444] sm:$0xf]  ;;  %v3087_v16 = vld [vmem:[#allocation5 + $0xc8] sm:$0xf] }
  0x60   :  { %v3273_v26 = vld [vmem:[#allocation5 + $0x250] sm:$0xf0]  ;;  %v3148_v31 = vor.u32 %v4430_v20, %v3145_v23  ;;  %v4426_v34 = vld [vmem:[#allocation5 + $0x124] sm:$0xf] }
  0x61   :  { %1591 = vmatpush.bf16.msra.mxu1 %v3340_v44  ;;  %1604 = vmatpush.bf16.msra.mxu2 %v3468_v45  ;;  %v3401_v28 = vld [vmem:[#allocation5 + $0x350] sm:$0xf0]  ;;  %v3276_v32 = vor.u32 %v4462_v24, %v3273_v26  ;;  %v4458_v36 = vld [vmem:[#allocation5 + $0x224] sm:$0xf] }
  0x62   :  { %1617 = vmatpush.bf16.msra.mxu3 %v3596_v49  ;;  %v3529_v30 = vld [vmem:[#allocation5 + $0x450] sm:$0xf0]  ;;  %v3404_v33 = vor.u32 %v4494_v27, %v3401_v28  ;;  %v4490_v40 = vld [vmem:[#allocation5 + $0x324] sm:$0xf] }
  0x63   :  { %1579 = vmatpush.bf16.msra.mxu0 %v3196_v55  ;;  %v3129_v35 = vld [vmem:[#allocation5 + $0x130] sm:$0xf0]  ;;  %v3532_v37 = vor.u32 %v4526_v29, %v3529_v30  ;;  %v4522_v44 = vld [vmem:[#allocation5 + $0x424] sm:$0xf]  ;;  %v3071_v30 = vld [vmem:[#allocation5 + $0xa8] sm:$0xf] }
  0x64   :  { %v3257_v39 = vld [vmem:[#allocation5 + $0x230] sm:$0xf0]  ;;  %v3132_v46 = vor.u32 %v4426_v34, %v3129_v35  ;;  %v4422_v47 = vld [vmem:[#allocation5 + $0x104] sm:$0xf] }
  0x65   :  { %1592 = vmatpush.bf16.msra.mxu1 %v3324_v56  ;;  %1605 = vmatpush.bf16.msra.mxu2 %v3452_v57  ;;  %v3385_v43 = vld [vmem:[#allocation5 + $0x330] sm:$0xf0]  ;;  %v3260_v49 = vor.u32 %v4458_v36, %v3257_v39  ;;  %v4454_v51 = vld [vmem:[#allocation5 + $0x204] sm:$0xf] }
  0x66   :  { %1618 = vmatpush.bf16.msra.mxu3 %v3580_v61  ;;  %v3513_v45 = vld [vmem:[#allocation5 + $0x430] sm:$0xf0]  ;;  %v3388_v50 = vor.u32 %v4490_v40, %v3385_v43  ;;  %v4486_v53 = vld [vmem:[#allocation5 + $0x304] sm:$0xf] }
  0x67   :  { %1580 = vmatpush.bf16.msra.mxu0 %v3180_v3  ;;  %v3113_v48 = vld [vmem:[#allocation5 + $0x110] sm:$0xf0]  ;;  %v3516_v54 = vor.u32 %v4522_v44, %v3513_v45  ;;  %v4518_v56 = vld [vmem:[#allocation5 + $0x404] sm:$0xf]  ;;  %v3231_v3 = vld [vmem:[#allocation5 + $0x1e8] sm:$0xf] }
  0x68   :  { %v3241_v52 = vld [vmem:[#allocation5 + $0x210] sm:$0xf0]  ;;  %v4578_v58 = vld [vmem:[#allocation5 + $0x5e4] sm:$0xf]  ;;  %v3116_v61 = vor.u32 %v4422_v47, %v3113_v48  ;;  %v3055_v45 = vld [vmem:[#allocation5 + $0x88] sm:$0xf] }
  0x69   :  { %1593 = vmatpush.bf16.msra.mxu1 %v3308_v4  ;;  %1606 = vmatpush.bf16.msra.mxu2 %v3436_v6  ;;  %v3369_v55 = vld [vmem:[#allocation5 + $0x310] sm:$0xf0]  ;;  %v4610_v60 = vld [vmem:[#allocation5 + $0x6e4] sm:$0xf]  ;;  %v3244_v1 = vor.u32 %v4454_v51, %v3241_v52  ;;  %v4453_v4 = vld [vmem:[#allocation5 + $0x1f4] sm:$0xf0] }
  0x6a   :  { %1619 = vmatpush.bf16.msra.mxu3 %v3564_v11  ;;  %v3497_v57 = vld [vmem:[#allocation5 + $0x410] sm:$0xf0]  ;;  %v3372_v2 = vor.u32 %v4486_v53, %v3369_v55  ;;  %v4574_v11 = vld [vmem:[#allocation5 + $0x5c4] sm:$0xf]  ;;  %v3232_v14 = vor.u32 %v4453_v4, %v3231_v3  ;;  %v3183_v47 = vld [vmem:[#allocation5 + $0x188] sm:$0xf] }
  0x6b   :  { %1581 = vmatpush.bf16.msra.mxu0 %v3164_v17  ;;  %v3737_v59 = vld [vmem:[#allocation5 + $0x5f0] sm:$0xf0]  ;;  %v3500_v6 = vor.u32 %v4518_v56, %v3497_v57  ;;  %v4606_v13 = vld [vmem:[#allocation5 + $0x6c4] sm:$0xf]  ;;  %v4417_v17 = vld [vmem:[#allocation5 + $0xd4] sm:$0xf0] }
  0x6c   :  { %v3865_v62 = vld [vmem:[#allocation5 + $0x6f0] sm:$0xf0]  ;;  %v3740_v8 = vor.u32 %v4578_v58, %v3737_v59  ;;  %v3088_v24 = vor.u32 %v4417_v17, %v3087_v16  ;;  %v4602_v27 = vld [vmem:[#allocation5 + $0x6a4] sm:$0xf]  ;;  %v4441_v48 = vld [vmem:[#allocation5 + $0x194] sm:$0xf0] }
  0x6d   :  { %1594 = vmatpush.bf16.msra.mxu1 %v3292_v18  ;;  %1607 = vmatpush.bf16.msra.mxu2 %v3420_v19  ;;  %v3868_v9 = vor.u32 %v4610_v60, %v3865_v62  ;;  %v3721_v12 = vld [vmem:[#allocation5 + $0x5d0] sm:$0xf0]  ;;  %v3215_v18 = vld [vmem:[#allocation5 + $0x1c8] sm:$0xf]  ;;  %v4449_v19 = vld [vmem:[#allocation5 + $0x1d4] sm:$0xf0]  ;;  %v3184_v55 = vor.u32 %v4441_v48, %v3183_v47 }
  0x6e   :  { %1620 = vmatpush.bf16.msra.mxu3 %v3548_v25  ;;  %v3849_v15 = vld [vmem:[#allocation5 + $0x6d0] sm:$0xf0]  ;;  %v3724_v20 = vor.u32 %v4574_v11, %v3721_v12  ;;  %v4570_v25 = vld [vmem:[#allocation5 + $0x5a4] sm:$0xf]  ;;  %v3216_v28 = vor.u32 %v4449_v19, %v3215_v18  ;;  %v3039_v57 = vld [vmem:[#allocation5 + $0x68] sm:$0xf] }
  0x6f   :  { %1582 = vmatpush.bf16.msra.mxu0 %v3148_v31  ;;  %v3852_v23 = vor.u32 %v4606_v13, %v3849_v15  ;;  %v3705_v26 = vld [vmem:[#allocation5 + $0x5b0] sm:$0xf0]  ;;  %v4413_v31 = vld [vmem:[#allocation5 + $0xb4] sm:$0xf0]  ;;  %v4598_v40 = vld [vmem:[#allocation5 + $0x684] sm:$0xf] }
  0x70   :  { %v3833_v29 = vld [vmem:[#allocation5 + $0x6b0] sm:$0xf0]  ;;  %v3708_v34 = vor.u32 %v4570_v25, %v3705_v26  ;;  %v3072_v36 = vor.u32 %v4413_v31, %v3071_v30  ;;  %v4562_v52 = vld [vmem:[#allocation5 + $0x564] sm:$0xf]  ;;  %v4405_v58 = vld [vmem:[#allocation5 + $0x74] sm:$0xf0] }
  0x71   :  { %1595 = vmatpush.bf16.msra.mxu1 %v3276_v32  ;;  %1608 = vmatpush.bf16.msra.mxu2 %v3404_v33  ;;  %v3199_v32 = vld [vmem:[#allocation5 + $0x1a8] sm:$0xf]  ;;  %v4445_v33 = vld [vmem:[#allocation5 + $0x1b4] sm:$0xf0]  ;;  %v3836_v35 = vor.u32 %v4602_v27, %v3833_v29  ;;  %v3689_v39 = vld [vmem:[#allocation5 + $0x590] sm:$0xf0]  ;;  %v3040_v63 = vor.u32 %v4405_v58, %v3039_v57 }
  0x72   :  { %1621 = vmatpush.bf16.msra.mxu3 %v3532_v37  ;;  %v4566_v37 = vld [vmem:[#allocation5 + $0x584] sm:$0xf]  ;;  %v3200_v43 = vor.u32 %v4445_v33, %v3199_v32  ;;  %v3817_v44 = vld [vmem:[#allocation5 + $0x690] sm:$0xf0]  ;;  %v3167_v59 = vld [vmem:[#allocation5 + $0x168] sm:$0xf] }
  0x73   :  { %1583 = vmatpush.bf16.msra.mxu0 %v3132_v46  ;;  %v4409_v46 = vld [vmem:[#allocation5 + $0x94] sm:$0xf0]  ;;  %v3673_v53 = vld [vmem:[#allocation5 + $0x570] sm:$0xf0]  ;;  %v4558_v0 = vld [vmem:[#allocation5 + $0x544] sm:$0xf] }
  0x74   :  { %v3056_v51 = vor.u32 %v4409_v46, %v3055_v45  ;;  %v3801_v56 = vld [vmem:[#allocation5 + $0x670] sm:$0xf0]  ;;  %v4437_v60 = vld [vmem:[#allocation5 + $0x174] sm:$0xf0]  ;;  %v4586_v16 = vld [vmem:[#allocation5 + $0x624] sm:$0xf] }
  0x75   :  { %1596 = vmatpush.bf16.msra.mxu1 %v3260_v49  ;;  %1609 = vmatpush.bf16.msra.mxu2 %v3388_v50  ;;  %v3692_v49 = vor.u32 %v4566_v37, %v3689_v39  ;;  %v3820_v50 = vor.u32 %v4598_v40, %v3817_v44  ;;  %v3168_v3 = vor.u32 %v4437_v60, %v3167_v59  ;;  %v3785_v4 = vld [vmem:[#allocation5 + $0x650] sm:$0xf0]  ;;  %v3007_v19 = vld [vmem:[#allocation5 + $0x28] sm:$0xf]  ;;  %v4550_v26 = vld [vmem:[#allocation5 + $0x504] sm:$0xf] }
  0x76   :  { %1622 = vmatpush.bf16.msra.mxu3 %v3516_v54  ;;  %v4594_v54 = vld [vmem:[#allocation5 + $0x664] sm:$0xf]  ;;  %v3641_v15 = vld [vmem:[#allocation5 + $0x530] sm:$0xf0]  ;;  %v2991_v32 = vld [vmem:[#allocation5 + $0x8] sm:$0xf] }
  0x77   :  { %1584 = vmatpush.bf16.msra.mxu0 %v3116_v61  ;;  %v3676_v61 = vor.u32 %v4562_v52, %v3673_v53  ;;  %v3804_v62 = vor.u32 %v4594_v54, %v3801_v56  ;;  %v3769_v18 = vld [vmem:[#allocation5 + $0x630] sm:$0xf0]  ;;  %v4582_v30 = vld [vmem:[#allocation5 + $0x604] sm:$0xf]  ;;  %v3359_v37 = vld [vmem:[#allocation5 + $0x2e8] sm:$0xf] }
  0x78   :  { %v3625_v27 = vld [vmem:[#allocation5 + $0x510] sm:$0xf0]  ;;  %v4485_v39 = vld [vmem:[#allocation5 + $0x2f4] sm:$0xf0]  ;;  %v3487_v40 = vld [vmem:[#allocation5 + $0x3e8] sm:$0xf] }
  0x79   :  { %1597 = vmatpush.bf16.msra.mxu1 %v3244_v1  ;;  %1610 = vmatpush.bf16.msra.mxu2 %v3372_v2  ;;  %v3657_v1 = vld [vmem:[#allocation5 + $0x550] sm:$0xf0]  ;;  %v4590_v2 = vld [vmem:[#allocation5 + $0x644] sm:$0xf]  ;;  %v4517_v44 = vld [vmem:[#allocation5 + $0x3f4] sm:$0xf0]  ;;  %v3360_v52 = vor.u32 %v4485_v39, %v3359_v37 }
  0x7a   :  { %1623 = vmatpush.bf16.msra.mxu3 %v3500_v6  ;;  %1585 = vmatmul.bf16.vlgmr.msra.gmra.mxu0 %v4952_v22  ;;  %v3023_v6 = vld [vmem:[#allocation5 + $0x48] sm:$0xf]  ;;  %v3660_v11 = vor.u32 %v4558_v0, %v3657_v1  ;;  %v3788_v12 = vor.u32 %v4590_v2, %v3785_v4  ;;  %v3753_v31 = vld [vmem:[#allocation5 + $0x610] sm:$0xf0]  ;;  %v4549_v46 = vld [vmem:[#allocation5 + $0x4f4] sm:$0xf0]  ;;  %v3488_v53 = vor.u32 %v4517_v44, %v3487_v40 }
  0x7b   :  { %1629 = vmatpush.bf16.msrb.mxu0 %v3740_v8  ;;  %v4401_v8 = vld [vmem:[#allocation5 + $0x54] sm:$0xf0]  ;;  %v3615_v45 = vld [vmem:[#allocation5 + $0x4e8] sm:$0xf]  ;;  %v3756_v47 = vor.u32 %v4582_v30, %v3753_v31 }
  0x7c   :  { %1611 = vmatmul.bf16.vlgmr.msra.gmra.mxu2 %v4947_v7  ;;  %1598 = vmatmul.bf16.vlgmr.msra.gmra.mxu1 %v4945_v5  ;;  %v3024_v13 = vor.u32 %v4401_v8, %v3023_v6  ;;  %v3616_v54 = vor.u32 %v4549_v46, %v3615_v45  ;;  %v4481_v56 = vld [vmem:[#allocation5 + $0x2d4] sm:$0xf0]  ;;  %v3471_v57 = vld [vmem:[#allocation5 + $0x3c8] sm:$0xf] }
  0x7d   :  { %1642 = vmatpush.bf16.msrb.mxu1 %v3868_v9  ;;  %1655 = vmatpush.bf16.msrb.mxu2 %v3104_v10  ;;  %v3151_v9 = vld [vmem:[#allocation5 + $0x148] sm:$0xf]  ;;  %v4433_v10 = vld [vmem:[#allocation5 + $0x154] sm:$0xf0] }
  0x7e   :  { %1668 = vmatpush.bf16.msrb.mxu3 %v3232_v14  ;;  %v4554_v14 = vld [vmem:[#allocation5 + $0x524] sm:$0xf]  ;;  %v3152_v17 = vor.u32 %v4433_v10, %v3151_v9  ;;  %v4513_v59 = vld [vmem:[#allocation5 + $0x3d4] sm:$0xf0]  ;;  %v3599_v60 = vld [vmem:[#allocation5 + $0x4c8] sm:$0xf] }
  0x7f   :  { %1624 = vmatmul.bf16.vlgmr.msra.gmra.mxu3 %v4959_v41  ;;  %1630 = vmatpush.bf16.msrb.mxu0 %v3724_v20  ;;  %v4397_v20 = vld [vmem:[#allocation5 + $0x34] sm:$0xf0]  ;;  %v3644_v25 = vor.u32 %v4554_v14, %v3641_v15  ;;  %v3472_v1 = vor.u32 %v4513_v59, %v3471_v57  ;;  %v3455_v6 = vld [vmem:[#allocation5 + $0x3a8] sm:$0xf] }
  0x80   :  { %v3008_v29 = vor.u32 %v4397_v20, %v3007_v19  ;;  %v4477_v4 = vld [vmem:[#allocation5 + $0x2b4] sm:$0xf0]  ;;  %v3583_v10 = vld [vmem:[#allocation5 + $0x4a8] sm:$0xf] }
  0x81   :  { %1643 = vmatpush.bf16.msrb.mxu1 %v3852_v23  ;;  %1656 = vmatpush.bf16.msrb.mxu2 %v3088_v24  ;;  %v3135_v23 = vld [vmem:[#allocation5 + $0x128] sm:$0xf]  ;;  %v4429_v24 = vld [vmem:[#allocation5 + $0x134] sm:$0xf0] }
  0x82   :  { %1669 = vmatpush.bf16.msrb.mxu3 %v3216_v28  ;;  %v3772_v28 = vor.u32 %v4586_v16, %v3769_v18  ;;  %v3136_v33 = vor.u32 %v4429_v24, %v3135_v23  ;;  %v4509_v9 = vld [vmem:[#allocation5 + $0x3b4] sm:$0xf0]  ;;  %v3439_v19 = vld [vmem:[#allocation5 + $0x388] sm:$0xf] }
  0x83   :  { %1631 = vmatpush.bf16.msrb.mxu0 %v3708_v34  ;;  %v4393_v34 = vld [vmem:[#allocation5 + $0x14] sm:$0xf0]  ;;  %v3456_v15 = vor.u32 %v4509_v9, %v3455_v6  ;;  %v3567_v24 = vld [vmem:[#allocation5 + $0x488] sm:$0xf] }
  0x84   :  { %v2992_v48 = vor.u32 %v4393_v34, %v2991_v32  ;;  %v4473_v18 = vld [vmem:[#allocation5 + $0x294] sm:$0xf0]  ;;  %v3295_v31 = vld [vmem:[#allocation5 + $0x268] sm:$0xf] }
  0x85   :  { %1644 = vmatpush.bf16.msrb.mxu1 %v3836_v35  ;;  %1657 = vmatpush.bf16.msrb.mxu2 %v3072_v36  ;;  %v3119_v35 = vld [vmem:[#allocation5 + $0x108] sm:$0xf]  ;;  %v4425_v36 = vld [vmem:[#allocation5 + $0x114] sm:$0xf0] }
  0x86   :  { %1670 = vmatpush.bf16.msrb.mxu3 %v3200_v43  ;;  %v3628_v43 = vor.u32 %v4550_v26, %v3625_v27  ;;  %v4505_v23 = vld [vmem:[#allocation5 + $0x394] sm:$0xf0]  ;;  %v3695_v26 = vld [vmem:[#allocation5 + $0x588] sm:$0xf] }
  0x87   :  { %1632 = vmatpush.bf16.msrb.mxu0 %v3692_v49  ;;  %v3743_v49 = vld [vmem:[#allocation5 + $0x5e8] sm:$0xf]  ;;  %v4569_v27 = vld [vmem:[#allocation5 + $0x594] sm:$0xf0] }
  0x88   :  { %v4469_v32 = vld [vmem:[#allocation5 + $0x274] sm:$0xf0]  ;;  %v3696_v34 = vor.u32 %v4569_v27, %v3695_v26  ;;  %v3679_v39 = vld [vmem:[#allocation5 + $0x568] sm:$0xf] }
  0x89   :  { %1645 = vmatpush.bf16.msrb.mxu1 %v3820_v50  ;;  %1658 = vmatpush.bf16.msrb.mxu2 %v3056_v51  ;;  %v4581_v50 = vld [vmem:[#allocation5 + $0x5f4] sm:$0xf0]  ;;  %v3120_v51 = vor.u32 %v4425_v36, %v3119_v35  ;;  %v3551_v36 = vld [vmem:[#allocation5 + $0x468] sm:$0xf] }
  0x8a   :  { %1671 = vmatpush.bf16.msrb.mxu3 %v3184_v55  ;;  %v3343_v55 = vld [vmem:[#allocation5 + $0x2c8] sm:$0xf]  ;;  %v3744_v58 = vor.u32 %v4581_v50, %v3743_v49  ;;  %v4501_v35 = vld [vmem:[#allocation5 + $0x374] sm:$0xf0] }
  0x8b   :  { %1633 = vmatpush.bf16.msrb.mxu0 %v3676_v61  ;;  %v4545_v61 = vld [vmem:[#allocation5 + $0x4d4] sm:$0xf0]  ;;  %v3344_v0 = vor.u32 %v4481_v56, %v3343_v55  ;;  %v3279_v46 = vld [vmem:[#allocation5 + $0x248] sm:$0xf] }
  0x8c   :  { %v3600_v2 = vor.u32 %v4545_v61, %v3599_v60  ;;  %v4533_v37 = vld [vmem:[#allocation5 + $0x474] sm:$0xf0]  ;;  %v3391_v60 = vld [vmem:[#allocation5 + $0x328] sm:$0xf] }
  0x8d   :  { %1646 = vmatpush.bf16.msrb.mxu1 %v3804_v62  ;;  %1659 = vmatpush.bf16.msrb.mxu2 %v3040_v63  ;;  %v3727_v62 = vld [vmem:[#allocation5 + $0x5c8] sm:$0xf]  ;;  %v4577_v63 = vld [vmem:[#allocation5 + $0x5d4] sm:$0xf0]  ;;  %v3552_v45 = vor.u32 %v4533_v37, %v3551_v36  ;;  %v4415_v36 = vld [vmem:[#allocation5 + $0xcc] sm:$0xf] }
  0x8e   :  { %1672 = vmatpush.bf16.msrb.mxu3 %v3168_v3  ;;  %v3327_v3 = vld [vmem:[#allocation5 + $0x2a8] sm:$0xf]  ;;  %v3728_v8 = vor.u32 %v4577_v63, %v3727_v62  ;;  %v4565_v40 = vld [vmem:[#allocation5 + $0x574] sm:$0xf0] }
  0x8f   :  { %1634 = vmatpush.bf16.msrb.mxu0 %v3660_v11  ;;  %v4541_v11 = vld [vmem:[#allocation5 + $0x4b4] sm:$0xf0]  ;;  %v3328_v14 = vor.u32 %v4477_v4, %v3327_v3  ;;  %v3680_v49 = vor.u32 %v4565_v40, %v3679_v39  ;;  %v3519_v63 = vld [vmem:[#allocation5 + $0x428] sm:$0xf]  ;;  %v3089_v39 = vld [vmem:[#allocation5 + $0xd8] sm:$0xf0] }
  0x90   :  { %v3584_v16 = vor.u32 %v4541_v11, %v3583_v10  ;;  %v4497_v50 = vld [vmem:[#allocation5 + $0x354] sm:$0xf0]  ;;  %v3247_v4 = vld [vmem:[#allocation5 + $0x208] sm:$0xf]  ;;  %v4447_v40 = vld [vmem:[#allocation5 + $0x1cc] sm:$0xf] }
  0x91   :  { %1647 = vmatpush.bf16.msrb.mxu1 %v3788_v12  ;;  %1660 = vmatpush.bf16.msrb.mxu2 %v3024_v13  ;;  %v3711_v12 = vld [vmem:[#allocation5 + $0x5a8] sm:$0xf]  ;;  %v4573_v13 = vld [vmem:[#allocation5 + $0x5b4] sm:$0xf0] }
  0x92   :  { %1673 = vmatpush.bf16.msrb.mxu3 %v3152_v17  ;;  %v3311_v17 = vld [vmem:[#allocation5 + $0x288] sm:$0xf]  ;;  %v3712_v20 = vor.u32 %v4573_v13, %v3711_v12  ;;  %v4461_v59 = vld [vmem:[#allocation5 + $0x234] sm:$0xf0] }
  0x93   :  { %1635 = vmatpush.bf16.msrb.mxu0 %v3644_v25  ;;  %v4537_v25 = vld [vmem:[#allocation5 + $0x494] sm:$0xf0]  ;;  %v3375_v10 = vld [vmem:[#allocation5 + $0x308] sm:$0xf] }
  0x94   :  { %v3568_v30 = vor.u32 %v4537_v25, %v3567_v24  ;;  %v4493_v62 = vld [vmem:[#allocation5 + $0x334] sm:$0xf0]  ;;  %v3503_v12 = vld [vmem:[#allocation5 + $0x408] sm:$0xf]  ;;  %v4451_v24 = vld [vmem:[#allocation5 + $0x1ec] sm:$0xf] }
  0x95   :  { %1648 = vmatpush.bf16.msrb.mxu1 %v3772_v28  ;;  %1661 = vmatpush.bf16.msrb.mxu2 %v3008_v29  ;;  %v3312_v28 = vor.u32 %v4473_v18, %v3311_v17  ;;  %v3440_v29 = vor.u32 %v4505_v23, %v3439_v19  ;;  %v4457_v6 = vld [vmem:[#allocation5 + $0x214] sm:$0xf0]  ;;  %v3871_v17 = vld [vmem:[#allocation5 + $0x6e8] sm:$0xf]  ;;  %v4419_v19 = vld [vmem:[#allocation5 + $0xec] sm:$0xf] }
  0x96   :  { %1674 = vmatpush.bf16.msrb.mxu3 %v3136_v33  ;;  %v3423_v33 = vld [vmem:[#allocation5 + $0x368] sm:$0xf]  ;;  %v4489_v11 = vld [vmem:[#allocation5 + $0x314] sm:$0xf0]  ;;  %v3105_v23 = vld [vmem:[#allocation5 + $0xf8] sm:$0xf0] }
  0x97   :  { %1636 = vmatpush.bf16.msrb.mxu0 %v3628_v43  ;;  %v3296_v43 = vor.u32 %v4469_v32, %v3295_v31  ;;  %v3424_v44 = vor.u32 %v4501_v35, %v3423_v33  ;;  %v4613_v18 = vld [vmem:[#allocation5 + $0x6f4] sm:$0xf0]  ;;  %v3233_v25 = vld [vmem:[#allocation5 + $0x1f8] sm:$0xf0]  ;;  %v3376_v26 = vor.u32 %v4489_v11, %v3375_v10  ;;  %v3108_v32 = vor.u32 %v4419_v19, %v3105_v23  ;;  %v3807_v11 = vld [vmem:[#allocation5 + $0x668] sm:$0xf] }
  0x98   :  { %v3872_v31 = vor.u32 %v4613_v18, %v3871_v17  ;;  %v3236_v33 = vor.u32 %v4451_v24, %v3233_v25  ;;  %v4609_v35 = vld [vmem:[#allocation5 + $0x6d4] sm:$0xf0]  ;;  %v3169_v17 = vld [vmem:[#allocation5 + $0x178] sm:$0xf0]  ;;  %v4467_v18 = vld [vmem:[#allocation5 + $0x26c] sm:$0xf] }
  0x99   :  { %1649 = vmatpush.bf16.msrb.mxu1 %v3756_v47  ;;  %1662 = vmatpush.bf16.msrb.mxu2 %v2992_v48  ;;  %v4465_v47 = vld [vmem:[#allocation5 + $0x254] sm:$0xf0]  ;;  %v3407_v48 = vld [vmem:[#allocation5 + $0x348] sm:$0xf]  ;;  %v3297_v19 = vld [vmem:[#allocation5 + $0x278] sm:$0xf0] }
  0x9a   :  { %1675 = vmatpush.bf16.msrb.mxu3 %v3120_v51  ;;  %1637 = vmatmul.bf16.vlgmr.msrb.gmra.mxu0 %v4961_v42  ;;  %v3535_v51 = vld [vmem:[#allocation5 + $0x448] sm:$0xf]  ;;  %v3280_v55 = vor.u32 %v4465_v47, %v3279_v46  ;;  %v3408_v56 = vor.u32 %v4497_v50, %v3407_v48  ;;  %v3092_v47 = vor.u32 %v4415_v36, %v3089_v39  ;;  %v4605_v50 = vld [vmem:[#allocation5 + $0x6b4] sm:$0xf0] }
  0x9b   :  { %1681 = vmatpush.bf16.msra.mxu0 %v3360_v52  ;;  %v4529_v52 = vld [vmem:[#allocation5 + $0x454] sm:$0xf0]  ;;  %v3791_v25 = vld [vmem:[#allocation5 + $0x648] sm:$0xf] }
  0x9c   :  { %1650 = vmatmul.bf16.vlgmr.msrb.gmra.mxu1 %v4957_v38  ;;  %1663 = vmatmul.bf16.vlgmr.msrb.gmra.mxu2 %v4950_v21  ;;  %v3536_v57 = vor.u32 %v4529_v52, %v3535_v51  ;;  %v4411_v51 = vld [vmem:[#allocation5 + $0xac] sm:$0xf] }
  0x9d   :  { %1694 = vmatpush.bf16.msra.mxu1 %v3488_v53  ;;  %1707 = vmatpush.bf16.msra.mxu2 %v3616_v54  ;;  %v3663_v53 = vld [vmem:[#allocation5 + $0x548] sm:$0xf]  ;;  %v4561_v54 = vld [vmem:[#allocation5 + $0x554] sm:$0xf0] }
  0x9e   :  { %1720 = vmatpush.bf16.msra.mxu3 %v3744_v58  ;;  %v3263_v58 = vld [vmem:[#allocation5 + $0x228] sm:$0xf]  ;;  %v3664_v61 = vor.u32 %v4561_v54, %v3663_v53  ;;  %v3073_v53 = vld [vmem:[#allocation5 + $0xb8] sm:$0xf0]  ;;  %v4443_v54 = vld [vmem:[#allocation5 + $0x1ac] sm:$0xf] }
  0x9f   :  { %1682 = vmatpush.bf16.msra.mxu0 %v3344_v0  ;;  %1676 = vmatmul.bf16.vlgmr.msrb.gmra.mxu3 %v4952_v22  ;;  %v4525_v0 = vld [vmem:[#allocation5 + $0x434] sm:$0xf0]  ;;  %v3264_v3 = vor.u32 %v4461_v59, %v3263_v58  ;;  %v3076_v59 = vor.u32 %v4411_v51, %v3073_v53  ;;  %v3265_v53 = vld [vmem:[#allocation5 + $0x238] sm:$0xf0] }
  0xa0   :  { %v3520_v9 = vor.u32 %v4525_v0, %v3519_v63  ;;  %v4407_v63 = vld [vmem:[#allocation5 + $0x8c] sm:$0xf] }
  0xa1   :  { %1695 = vmatpush.bf16.msra.mxu1 %v3472_v1  ;;  %1708 = vmatpush.bf16.msra.mxu2 %v3600_v2  ;;  %v3647_v1 = vld [vmem:[#allocation5 + $0x528] sm:$0xf]  ;;  %v4557_v2 = vld [vmem:[#allocation5 + $0x534] sm:$0xf0] }
  0xa2   :  { %1721 = vmatpush.bf16.msra.mxu3 %v3728_v8  ;;  %v3392_v8 = vor.u32 %v4493_v62, %v3391_v60  ;;  %v3648_v13 = vor.u32 %v4557_v2, %v3647_v1  ;;  %v4601_v62 = vld [vmem:[#allocation5 + $0x694] sm:$0xf0]  ;;  %v3057_v1 = vld [vmem:[#allocation5 + $0x98] sm:$0xf0]  ;;  %v4439_v2 = vld [vmem:[#allocation5 + $0x18c] sm:$0xf] }
  0xa3   :  { %1683 = vmatpush.bf16.msra.mxu0 %v3328_v14  ;;  %v4521_v14 = vld [vmem:[#allocation5 + $0x414] sm:$0xf0] }
  0xa4   :  { %v3504_v27 = vor.u32 %v4521_v14, %v3503_v12  ;;  %v4597_v12 = vld [vmem:[#allocation5 + $0x674] sm:$0xf0] }
  0xa5   :  { %1696 = vmatpush.bf16.msra.mxu1 %v3456_v15  ;;  %1709 = vmatpush.bf16.msra.mxu2 %v3584_v16  ;;  %v3631_v15 = vld [vmem:[#allocation5 + $0x508] sm:$0xf]  ;;  %v4553_v16 = vld [vmem:[#allocation5 + $0x514] sm:$0xf0] }
  0xa6   :  { %1722 = vmatpush.bf16.msra.mxu3 %v3712_v20  ;;  %v3248_v20 = vor.u32 %v4457_v6, %v3247_v4  ;;  %v4471_v4 = vld [vmem:[#allocation5 + $0x28c] sm:$0xf]  ;;  %v3313_v6 = vld [vmem:[#allocation5 + $0x298] sm:$0xf0] }
  0xa7   :  { %1684 = vmatpush.bf16.msra.mxu0 %v3312_v28  ;;  %v4483_v28 = vld [vmem:[#allocation5 + $0x2ec] sm:$0xf]  ;;  %v3316_v14 = vor.u32 %v4471_v4, %v3313_v6  ;;  %v3489_v6 = vld [vmem:[#allocation5 + $0x3f8] sm:$0xf0] }
  0xa8   :  { %v4515_v4 = vld [vmem:[#allocation5 + $0x3ec] sm:$0xf] }
  0xa9   :  { %1697 = vmatpush.bf16.msra.mxu1 %v3440_v29  ;;  %1710 = vmatpush.bf16.msra.mxu2 %v3568_v30  ;;  %v3361_v29 = vld [vmem:[#allocation5 + $0x2f8] sm:$0xf0]  ;;  %v3632_v30 = vor.u32 %v4553_v16, %v3631_v15  ;;  %v4435_v16 = vld [vmem:[#allocation5 + $0x16c] sm:$0xf] }
  0xaa   :  { %1723 = vmatpush.bf16.msra.mxu3 %v3696_v34  ;;  %v3855_v34 = vld [vmem:[#allocation5 + $0x6c8] sm:$0xf]  ;;  %v3364_v37 = vor.u32 %v4483_v28, %v3361_v29  ;;  %v3041_v15 = vld [vmem:[#allocation5 + $0x78] sm:$0xf0]  ;;  %v3172_v24 = vor.u32 %v4435_v16, %v3169_v17  ;;  %v3300_v28 = vor.u32 %v4467_v18, %v3297_v19  ;;  %v4611_v17 = vld [vmem:[#allocation5 + $0x6ec] sm:$0xf] }
  0xab   :  { %1685 = vmatpush.bf16.msra.mxu0 %v3296_v43  ;;  %v3217_v43 = vld [vmem:[#allocation5 + $0x1d8] sm:$0xf0]  ;;  %v3856_v46 = vor.u32 %v4609_v35, %v3855_v34 }
  0xac   :  { %v3220_v48 = vor.u32 %v4447_v40, %v3217_v43  ;;  %v3025_v29 = vld [vmem:[#allocation5 + $0x58] sm:$0xf0]  ;;  %v3775_v40 = vld [vmem:[#allocation5 + $0x628] sm:$0xf]  ;;  %v4589_v43 = vld [vmem:[#allocation5 + $0x634] sm:$0xf0] }
  0xad   :  { %1698 = vmatpush.bf16.msra.mxu1 %v3424_v44  ;;  %1711 = vmatpush.bf16.msra.mxu2 %v3552_v45  ;;  %v4479_v44 = vld [vmem:[#allocation5 + $0x2cc] sm:$0xf]  ;;  %v3345_v45 = vld [vmem:[#allocation5 + $0x2d8] sm:$0xf0] }
  0xae   :  { %1724 = vmatpush.bf16.msra.mxu3 %v3680_v49  ;;  %v3839_v49 = vld [vmem:[#allocation5 + $0x6a8] sm:$0xf]  ;;  %v3348_v52 = vor.u32 %v4479_v44, %v3345_v45  ;;  %v4395_v44 = vld [vmem:[#allocation5 + $0x2c] sm:$0xf]  ;;  %v3873_v18 = vld [vmem:[#allocation5 + $0x6f8] sm:$0xf0] }
  0xaf   :  { %1686 = vmatpush.bf16.msra.mxu0 %v3280_v55  ;;  %v3201_v55 = vld [vmem:[#allocation5 + $0x1b8] sm:$0xf0]  ;;  %v3840_v58 = vor.u32 %v4605_v50, %v3839_v49  ;;  %v4427_v49 = vld [vmem:[#allocation5 + $0x12c] sm:$0xf] }
  0xb0   :  { %v3204_v60 = vor.u32 %v4443_v54, %v3201_v55  ;;  %v3137_v50 = vld [vmem:[#allocation5 + $0x138] sm:$0xf0]  ;;  %v3776_v55 = vor.u32 %v4589_v43, %v3775_v40  ;;  %v4507_v40 = vld [vmem:[#allocation5 + $0x3ac] sm:$0xf] }
  0xb1   :  { %1699 = vmatpush.bf16.msra.mxu1 %v3408_v56  ;;  %1712 = vmatpush.bf16.msra.mxu2 %v3536_v57  ;;  %v4475_v56 = vld [vmem:[#allocation5 + $0x2ac] sm:$0xf]  ;;  %v3329_v57 = vld [vmem:[#allocation5 + $0x2b8] sm:$0xf0] }
  0xb2   :  { %1725 = vmatpush.bf16.msra.mxu3 %v3664_v61  ;;  %v3823_v61 = vld [vmem:[#allocation5 + $0x688] sm:$0xf]  ;;  %v3332_v0 = vor.u32 %v4475_v56, %v3329_v57  ;;  %v4585_v57 = vld [vmem:[#allocation5 + $0x614] sm:$0xf0]  ;;  %v3457_v43 = vld [vmem:[#allocation5 + $0x3b8] sm:$0xf0] }
  0xb3   :  { %1687 = vmatpush.bf16.msra.mxu0 %v3264_v3  ;;  %v3185_v3 = vld [vmem:[#allocation5 + $0x198] sm:$0xf0]  ;;  %v3759_v56 = vld [vmem:[#allocation5 + $0x608] sm:$0xf] }
  0xb4   :  { %v3188_v10 = vor.u32 %v4439_v2, %v3185_v3  ;;  %v4455_v2 = vld [vmem:[#allocation5 + $0x20c] sm:$0xf]  ;;  %v3249_v3 = vld [vmem:[#allocation5 + $0x218] sm:$0xf0] }
  0xb5   :  { %1700 = vmatpush.bf16.msra.mxu1 %v3392_v8  ;;  %1713 = vmatpush.bf16.msra.mxu2 %v3520_v9  ;;  %v3824_v8 = vor.u32 %v4601_v62, %v3823_v61  ;;  %v3060_v9 = vor.u32 %v4407_v63, %v3057_v1  ;;  %v2993_v61 = vld [vmem:[#allocation5 + $0x18] sm:$0xf0]  ;;  %v4423_v62 = vld [vmem:[#allocation5 + $0x10c] sm:$0xf] }
  0xb6   :  { %1726 = vmatpush.bf16.msra.mxu3 %v3648_v13  ;;  %v4403_v13 = vld [vmem:[#allocation5 + $0x6c] sm:$0xf]  ;;  %v3121_v1 = vld [vmem:[#allocation5 + $0x118] sm:$0xf0] }
  0xb7   :  { %1688 = vmatpush.bf16.msra.mxu0 %v3248_v20  ;;  %v3808_v20 = vor.u32 %v4597_v12, %v3807_v11  ;;  %v3044_v23 = vor.u32 %v4403_v13, %v3041_v15  ;;  %v1482_v34 = vpop.f32.mrf.mxu0  ;;  %v3617_v11 = vld [vmem:[#allocation5 + $0x4f8] sm:$0xf0]  ;;  %v4579_v12 = vld [vmem:[#allocation5 + $0x5ec] sm:$0xf]  ;;  %v3124_v16 = vor.u32 %v4423_v62, %v3121_v1 }
  0xb8   :  { %v1495_v36 = vpop.f32.mrf.mxu1  ;;  %v3745_v13 = vld [vmem:[#allocation5 + $0x5f8] sm:$0xf0] }
  0xb9   :  { %1701 = vmatpush.bf16.msra.mxu1 %v3376_v26  ;;  %1714 = vmatpush.bf16.msra.mxu2 %v3504_v27  ;;  %v4593_v26 = vld [vmem:[#allocation5 + $0x654] sm:$0xf0]  ;;  %v4399_v27 = vld [vmem:[#allocation5 + $0x4c] sm:$0xf]  ;;  %v1496_v45 = vadd.f32 %v1495_v36, %v1482_v34 }
  0xba   :  { %1727 = vmatpush.bf16.msra.mxu3 %v3632_v30  ;;  %1689 = vmatmul.bf16.vlgmr.msra.gmra.mxu0 %v4945_v5  ;;  %v4431_v30 = vld [vmem:[#allocation5 + $0x14c] sm:$0xf]  ;;  %v3792_v35 = vor.u32 %v4593_v26, %v3791_v25  ;;  %v3748_v26 = vor.u32 %v4579_v12, %v3745_v13  ;;  %v3809_v12 = vld [vmem:[#allocation5 + $0x678] sm:$0xf0] }
  0xbb   :  { %1733 = vmatpush.bf16.msrb.mxu0 %v3872_v31  ;;  %v3153_v31 = vld [vmem:[#allocation5 + $0x158] sm:$0xf0]  ;;  %v4607_v34 = vld [vmem:[#allocation5 + $0x6cc] sm:$0xf] }
  0xbc   :  { %1715 = vmatmul.bf16.vlgmr.msra.gmra.mxu2 %v4959_v41  ;;  %1702 = vmatmul.bf16.vlgmr.msra.gmra.mxu1 %v4947_v7  ;;  %v3156_v39 = vor.u32 %v4431_v30, %v3153_v31  ;;  %v3876_v30 = vor.u32 %v4611_v17, %v3873_v18  ;;  %v3601_v31 = vld [vmem:[#allocation5 + $0x4d8] sm:$0xf0]  ;;  %v4527_v18 = vld [vmem:[#allocation5 + $0x44c] sm:$0xf] }
  0xbd   :  { %1746 = vmatpush.bf16.msrb.mxu1 %v3108_v32  ;;  %1759 = vmatpush.bf16.msrb.mxu2 %v3236_v33  ;;  %v4463_v32 = vld [vmem:[#allocation5 + $0x24c] sm:$0xf]  ;;  %v3281_v33 = vld [vmem:[#allocation5 + $0x258] sm:$0xf0] }
  0xbe   :  { %1772 = vmatpush.bf16.msrb.mxu3 %v3364_v37  ;;  %v3028_v37 = vor.u32 %v4399_v27, %v3025_v29  ;;  %v4511_v27 = vld [vmem:[#allocation5 + $0x3cc] sm:$0xf]  ;;  %v3409_v17 = vld [vmem:[#allocation5 + $0x358] sm:$0xf0] }
  0xbf   :  { %1728 = vmatmul.bf16.vlgmr.msra.gmra.mxu3 %v4961_v42  ;;  %1734 = vmatpush.bf16.msrb.mxu0 %v3856_v46  ;;  %v4543_v29 = vld [vmem:[#allocation5 + $0x4cc] sm:$0xf] }
  0xc1   :  { %1747 = vmatpush.bf16.msrb.mxu1 %v3092_v47  ;;  %1760 = vmatpush.bf16.msrb.mxu2 %v3220_v48  ;;  %v3284_v47 = vor.u32 %v4463_v32, %v3281_v33  ;;  %v3009_v48 = vld [vmem:[#allocation5 + $0x38] sm:$0xf0]  ;;  %v4575_v32 = vld [vmem:[#allocation5 + $0x5cc] sm:$0xf] }
  0xc2   :  { %1773 = vmatpush.bf16.msrb.mxu3 %v3348_v52  ;;  %v4459_v52 = vld [vmem:[#allocation5 + $0x22c] sm:$0xf]  ;;  %v3729_v33 = vld [vmem:[#allocation5 + $0x5d8] sm:$0xf0] }
  0xc3   :  { %1735 = vmatpush.bf16.msrb.mxu0 %v3840_v58  ;;  %v3012_v58 = vor.u32 %v4395_v44, %v3009_v48  ;;  %v4539_v44 = vld [vmem:[#allocation5 + $0x4ac] sm:$0xf]  ;;  %v3713_v48 = vld [vmem:[#allocation5 + $0x5b8] sm:$0xf0] }
  0xc5   :  { %1748 = vmatpush.bf16.msrb.mxu1 %v3076_v59  ;;  %1761 = vmatpush.bf16.msrb.mxu2 %v3204_v60  ;;  %v3140_v59 = vor.u32 %v4427_v49, %v3137_v50  ;;  %v4391_v60 = vld [vmem:[#allocation5 + $0xc] sm:$0xf]  ;;  %v3841_v50 = vld [vmem:[#allocation5 + $0x6b8] sm:$0xf0] }
  0xc6   :  { %1774 = vmatpush.bf16.msrb.mxu3 %v3332_v0  ;;  %v3268_v0 = vor.u32 %v4459_v52, %v3265_v53  ;;  %v2996_v15 = vor.u32 %v4391_v60, %v2993_v61  ;;  %v4603_v49 = vld [vmem:[#allocation5 + $0x6ac] sm:$0xf]  ;;  %v3825_v61 = vld [vmem:[#allocation5 + $0x698] sm:$0xf0] }
  0xc7   :  { %1736 = vmatpush.bf16.msrb.mxu0 %v3824_v8  ;;  %v1508_v46 = vpop.f32.mrf.mxu2  ;;  %v1521_v51 = vpop.f32.mrf.mxu3  ;;  %v4547_v8 = vld [vmem:[#allocation5 + $0x4ec] sm:$0xf] }
  0xc8   :  { %v1509_v54 = vadd.f32 %v1508_v46, %v1496_v45  ;;  %v3620_v25 = vor.u32 %v4547_v8, %v3617_v11  ;;  %v3585_v46 = vld [vmem:[#allocation5 + $0x4b8] sm:$0xf0]  ;;  %v4599_v60 = vld [vmem:[#allocation5 + $0x68c] sm:$0xf] }
  0xc9   :  { %1749 = vmatpush.bf16.msrb.mxu1 %v3060_v9  ;;  %1762 = vmatpush.bf16.msrb.mxu2 %v3188_v10  ;;  %v1484_v9 = vpop.f32.mrf.mxu0  ;;  %v3760_v10 = vor.u32 %v4585_v57, %v3759_v56  ;;  %v3588_v52 = vor.u32 %v4539_v44, %v3585_v46  ;;  %v4535_v56 = vld [vmem:[#allocation5 + $0x48c] sm:$0xf]  ;;  %v3844_v57 = vor.u32 %v4603_v49, %v3841_v50  ;;  %v3553_v8 = vld [vmem:[#allocation5 + $0x478] sm:$0xf0] }
  0xca   :  { %1775 = vmatpush.bf16.msrb.mxu3 %v3316_v14  ;;  %v4979_v63 = vadd.f32 %v1521_v51, %v1509_v54  ;;  %v1497_v14 = vpop.f32.mrf.mxu1  ;;  %v3460_v51 = vor.u32 %v4507_v40, %v3457_v43  ;;  %v4503_v54 = vld [vmem:[#allocation5 + $0x38c] sm:$0xf]  ;;  %v3649_v43 = vld [vmem:[#allocation5 + $0x538] sm:$0xf0] }
  0xcb   :  { %1737 = vmatpush.bf16.msrb.mxu0 %v3808_v20  ;;  %v3252_v20 = vor.u32 %v4455_v2, %v3249_v3  ;;  %v4499_v2 = vld [vmem:[#allocation5 + $0x36c] sm:$0xf]  ;;  %v3425_v3 = vld [vmem:[#allocation5 + $0x378] sm:$0xf0] }
  0xcc   :  { %v4563_v9 = vld [vmem:[#allocation5 + $0x56c] sm:$0xf]  ;;  %v3428_v13 = vor.u32 %v4499_v2, %v3425_v3  ;;  %v3377_v50 = vld [vmem:[#allocation5 + $0x318] sm:$0xf0] }
  0xcd   :  { %1750 = vmatpush.bf16.msrb.mxu1 %v3044_v23  ;;  %1763 = vmatpush.bf16.msrb.mxu2 %v3172_v24  ;;  %v3492_v23 = vor.u32 %v4515_v4, %v3489_v6  ;;  %v4531_v4 = vld [vmem:[#allocation5 + $0x46c] sm:$0xf]  ;;  %v3828_v6 = vor.u32 %v4599_v60, %v3825_v61 }
  0xce   :  { %1776 = vmatpush.bf16.msrb.mxu3 %v3300_v28  ;;  %v3473_v28 = vld [vmem:[#allocation5 + $0x3d8] sm:$0xf0]  ;;  %v4595_v11 = vld [vmem:[#allocation5 + $0x66c] sm:$0xf]  ;;  %v3556_v14 = vor.u32 %v4531_v4, %v3553_v8  ;;  %v3975_v8 = vld [vmem:[#allocation8 + $0xc0] sm:$0xf] }
  0xcf   :  { %1738 = vmatpush.bf16.msrb.mxu0 %v3792_v35  ;;  %v1510_v19 = vpop.f32.mrf.mxu2  ;;  %v1523_v24 = vpop.f32.mrf.mxu3  ;;  %v3857_v35 = vld [vmem:[#allocation5 + $0x6d8] sm:$0xf0]  ;;  %v3476_v36 = vor.u32 %v4511_v27, %v3473_v28  ;;  %v4555_v40 = vld [vmem:[#allocation5 + $0x52c] sm:$0xf] }
  0xd0   :  { %v3860_v45 = vor.u32 %v4607_v34, %v3857_v35  ;;  %v4559_v24 = vld [vmem:[#allocation5 + $0x54c] sm:$0xf]  ;;  %v3793_v27 = vld [vmem:[#allocation5 + $0x658] sm:$0xf0]  ;;  %v3652_v49 = vor.u32 %v4555_v40, %v3649_v43  ;;  %v4039_v40 = vld [vmem:[#allocation8 + $0x140] sm:$0xf] }
  0xd1   :  { %1751 = vmatpush.bf16.msrb.mxu1 %v3028_v37  ;;  %1764 = vmatpush.bf16.msrb.mxu2 %v3156_v39  ;;  %v3604_v37 = vor.u32 %v4543_v29, %v3601_v31  ;;  %v3732_v39 = vor.u32 %v4575_v32, %v3729_v33  ;;  %v4491_v34 = vld [vmem:[#allocation5 + $0x32c] sm:$0xf]  ;;  %v3393_v35 = vld [vmem:[#allocation5 + $0x338] sm:$0xf0]  ;;  %v4656_v43 = vld [vmem:[#allocation8 + $0x14c] sm:$0xf0] }
  0xd2   :  { %1777 = vmatpush.bf16.msrb.mxu3 %v3284_v47  ;;  %v4571_v47 = vld [vmem:[#allocation5 + $0x5ac] sm:$0xf]  ;;  %v3396_v46 = vor.u32 %v4491_v34, %v3393_v35 }
  0xd3   :  { %1739 = vmatpush.bf16.msrb.mxu0 %v3776_v55  ;;  %v3716_v53 = vor.u32 %v4571_v47, %v3713_v48  ;;  %v3441_v55 = vld [vmem:[#allocation5 + $0x398] sm:$0xf0]  ;;  %v4587_v44 = vld [vmem:[#allocation5 + $0x62c] sm:$0xf] }
  0xd4   :  { %v4487_v47 = vld [vmem:[#allocation5 + $0x30c] sm:$0xf] }
  0xd5   :  { %1752 = vmatpush.bf16.msrb.mxu1 %v3012_v58  ;;  %1765 = vmatpush.bf16.msrb.mxu2 %v3140_v59  ;;  %v3569_v58 = vld [vmem:[#allocation5 + $0x498] sm:$0xf0]  ;;  %v4567_v59 = vld [vmem:[#allocation5 + $0x58c] sm:$0xf]  ;;  %v3380_v61 = vor.u32 %v4487_v47, %v3377_v50  ;;  %v3895_v47 = vld [vmem:[#allocation8 + $0x20] sm:$0xf] }
  0xd6   :  { %1778 = vmatpush.bf16.msrb.mxu3 %v3268_v0  ;;  %v4023_v50 = vld [vmem:[#allocation8 + $0x120] sm:$0xf] }
  0xd7   :  { %1740 = vmatpush.bf16.msrb.mxu0 %v3760_v10  ;;  %v4985_v62 = vpop.f32.mrf.mxu0  ;;  %v3681_v10 = vld [vmem:[#allocation5 + $0x578] sm:$0xf0] }
  0xd9   :  { %1753 = vmatpush.bf16.msrb.mxu1 %v2996_v15  ;;  %1766 = vmatpush.bf16.msrb.mxu2 %v3124_v16  ;;  %v4987_v0 = vpop.f32.mrf.mxu1  ;;  %v3684_v15 = vor.u32 %v4563_v9, %v3681_v10  ;;  %v4495_v16 = vld [vmem:[#allocation5 + $0x34c] sm:$0xf]  ;;  %v4640_v9 = vld [vmem:[#allocation8 + $0xcc] sm:$0xf0]  ;;  %v4103_v10 = vld [vmem:[#allocation8 + $0x1c0] sm:$0xf] }
  0xda   :  { %1779 = vmatpush.bf16.msrb.mxu3 %v3252_v20  ;;  %1741 = vmatmul.bf16.vlgmr.msrb.gmra.mxu0 %v4957_v38  ;;  %v3812_v20 = vor.u32 %v4595_v11, %v3809_v12  ;;  %v3412_v29 = vor.u32 %v4495_v16, %v3409_v17  ;;  %v4672_v11 = vld [vmem:[#allocation8 + $0x1cc] sm:$0xf0]  ;;  %v3976_v12 = vor.u32 %v4640_v9, %v3975_v8  ;;  %v4087_v16 = vld [vmem:[#allocation8 + $0x1a0] sm:$0xf]  ;;  %v3977_v8 = vld [vmem:[#allocation8 + $0xd0] sm:$0xf0] }
  0xdb   :  { %1785 = vmatpush.bf16.msra.mxu0 %v3492_v23  ;;  %v3537_v23 = vld [vmem:[#allocation5 + $0x458] sm:$0xf0]  ;;  %v4668_v17 = vld [vmem:[#allocation8 + $0x1ac] sm:$0xf0]  ;;  %v4670_v9 = vld [vmem:[#allocation8 + $0x1c4] sm:$0xf] }
  0xdc   :  { %1767 = vmatmul.bf16.vlgmr.msrb.gmra.mxu2 %v4952_v22  ;;  %1754 = vmatmul.bf16.vlgmr.msrb.gmra.mxu1 %v4950_v21  ;;  %v3697_v22 = vld [vmem:[#allocation5 + $0x598] sm:$0xf0]  ;;  %v3572_v21 = vor.u32 %v4535_v56, %v3569_v58  ;;  %v3540_v32 = vor.u32 %v4527_v18, %v3537_v23  ;;  %v1839_v18 = vld [vmem:[#allocation7] sm:$0xf]  ;;  %v4088_v23 = vor.u32 %v4668_v17, %v4087_v16  ;;  %v4089_v16 = vld [vmem:[#allocation8 + $0x1b0] sm:$0xf0] }
  0xdd   :  { %1798 = vmatpush.bf16.msra.mxu1 %v3620_v25  ;;  %1811 = vmatpush.bf16.msra.mxu2 %v3748_v26  ;;  %v3700_v1 = vor.u32 %v4567_v59, %v3697_v22  ;;  %v3665_v25 = vld [vmem:[#allocation5 + $0x558] sm:$0xf0]  ;;  %v4591_v26 = vld [vmem:[#allocation5 + $0x64c] sm:$0xf]  ;;  %v3991_v59 = vld [vmem:[#allocation8 + $0xe0] sm:$0xf] }
  0xde   :  { %1824 = vmatpush.bf16.msra.mxu3 %v3876_v30  ;;  %v3668_v33 = vor.u32 %v4559_v24, %v3665_v25  ;;  %v3633_v56 = vld [vmem:[#allocation5 + $0x518] sm:$0xf0]  ;;  %v4644_v22 = vld [vmem:[#allocation8 + $0xec] sm:$0xf0]  ;;  %1841 = vst [vmem:[#allocation1] ss:$9 sm:$0xff] %v1839_v18 }
  0xdf   :  { %1780 = vmatmul.bf16.vlgmr.msrb.gmra.mxu3 %v4945_v5  ;;  %1786 = vmatpush.bf16.msra.mxu0 %v3476_v36  ;;  %v3444_v5 = vor.u32 %v4503_v54, %v3441_v55  ;;  %v4989_v19 = vpop.f32.mrf.mxu2  ;;  %v1536_v30 = vpop.f32.mrf.mxu0  ;;  %v4523_v36 = vld [vmem:[#allocation5 + $0x42c] sm:$0xf]  ;;  %v3761_v58 = vld [vmem:[#allocation5 + $0x618] sm:$0xf0]  ;;  %v3992_v4 = vor.u32 %v4644_v22, %v3991_v59  ;;  %v3943_v24 = vld [vmem:[#allocation8 + $0x80] sm:$0xf] }
  0xe0   :  { %v4551_v55 = vld [vmem:[#allocation5 + $0x50c] sm:$0xf]  ;;  %v4071_v25 = vld [vmem:[#allocation8 + $0x180] sm:$0xf]  ;;  %v4642_v59 = vld [vmem:[#allocation8 + $0xe4] sm:$0xf] }
  0xe1   :  { %1799 = vmatpush.bf16.msra.mxu1 %v3604_v37  ;;  %1812 = vmatpush.bf16.msra.mxu2 %v3732_v39  ;;  %v1549_v31 = vpop.f32.mrf.mxu1  ;;  %v3796_v37 = vor.u32 %v4591_v26, %v3793_v27  ;;  %v3521_v39 = vld [vmem:[#allocation5 + $0x438] sm:$0xf0]  ;;  %v3636_v2 = vor.u32 %v4551_v55, %v3633_v56  ;;  %v4664_v26 = vld [vmem:[#allocation8 + $0x18c] sm:$0xf0]  ;;  %v3927_v30 = vld [vmem:[#allocation8 + $0x60] sm:$0xf] }
  0xe2   :  { %1825 = vmatpush.bf16.msra.mxu3 %v3860_v45  ;;  %v4991_v28 = vpop.f32.mrf.mxu3  ;;  %v3777_v45 = vld [vmem:[#allocation5 + $0x638] sm:$0xf0]  ;;  %v3524_v48 = vor.u32 %v4523_v36, %v3521_v39  ;;  %v4628_v31 = vld [vmem:[#allocation8 + $0x6c] sm:$0xf0]  ;;  %v3911_v36 = vld [vmem:[#allocation8 + $0x40] sm:$0xf] }
  0xe3   :  { %1787 = vmatpush.bf16.msra.mxu0 %v3460_v51  ;;  %v4519_v51 = vld [vmem:[#allocation5 + $0x40c] sm:$0xf]  ;;  %v3780_v54 = vor.u32 %v4587_v44, %v3777_v45  ;;  %v4616_v55 = vld [vmem:[#allocation8 + $0xc] sm:$0xf0]  ;;  %v4007_v56 = vld [vmem:[#allocation8 + $0x100] sm:$0xf] }
  0xe4   :  { %v3993_v22 = vld [vmem:[#allocation8 + $0xf0] sm:$0xf0] }
  0xe5   :  { %1800 = vmatpush.bf16.msra.mxu1 %v3588_v52  ;;  %1813 = vmatpush.bf16.msra.mxu2 %v3716_v53  ;;  %v3505_v52 = vld [vmem:[#allocation5 + $0x418] sm:$0xf0]  ;;  %v1843_v18 = vld [vmem:[#allocation1 + $0x9] sm:$0xff] }
  0xe6   :  { %1826 = vmatpush.bf16.msra.mxu3 %v3844_v57  ;;  %v4583_v57 = vld [vmem:[#allocation5 + $0x60c] sm:$0xf]  ;;  %v1842_v17 = vld [vmem:[#allocation1] sm:$0xff] }
  0xe7   :  { %1788 = vmatpush.bf16.msra.mxu0 %v3444_v5  ;;  %v1562_v53 = vpop.f32.mrf.mxu2  ;;  %v4119_v5 = vld [vmem:[#allocation8 + $0x1e0] sm:$0xf]  ;;  %v3764_v3 = vor.u32 %v4583_v57, %v3761_v58  ;;  %v4648_v58 = vld [vmem:[#allocation8 + $0x10c] sm:$0xf0] }
  0xe9   :  { %1801 = vmatpush.bf16.msra.mxu1 %v3572_v21  ;;  %1814 = vmatpush.bf16.msra.mxu2 %v3700_v1  ;;  %v4676_v21 = vld [vmem:[#allocation8 + $0x1ec] sm:$0xf0]  ;;  %v3508_v1 = vor.u32 %v4519_v51, %v3505_v52 }
  0xea   :  { %1827 = vmatpush.bf16.msra.mxu3 %v3828_v6  ;;  %v1575_v60 = vpop.f32.mrf.mxu3  ;;  %v4120_v6 = vor.u32 %v4676_v21, %v4119_v5  ;;  %v4652_v51 = vld [vmem:[#allocation8 + $0x12c] sm:$0xf0]  ;;  %v4121_v5 = vld [vmem:[#allocation8 + $0x1f0] sm:$0xf0] }
  0xeb   :  { %1789 = vmatpush.bf16.msra.mxu0 %v3428_v13  ;;  %v4104_v13 = vor.u32 %v4672_v11, %v4103_v10  ;;  %v4024_v53 = vor.u32 %v4652_v51, %v4023_v50  ;;  %v4105_v10 = vld [vmem:[#allocation8 + $0x1d0] sm:$0xf0]  ;;  %v4654_v51 = vld [vmem:[#allocation8 + $0x144] sm:$0xf] }
  0xec   :  { %v3913_v50 = vld [vmem:[#allocation8 + $0x50] sm:$0xf0] }
  0xed   :  { %1802 = vmatpush.bf16.msra.mxu1 %v3556_v14  ;;  %1815 = vmatpush.bf16.msra.mxu2 %v3684_v15  ;;  %v3959_v14 = vld [vmem:[#allocation8 + $0xa0] sm:$0xf]  ;;  %v4636_v15 = vld [vmem:[#allocation8 + $0xac] sm:$0xf0] }
  0xee   :  { %1828 = vmatpush.bf16.msra.mxu3 %v3812_v20  ;;  %v3960_v20 = vor.u32 %v4636_v15, %v3959_v14  ;;  %v4634_v14 = vld [vmem:[#allocation8 + $0xa4] sm:$0xf]  ;;  %v3961_v15 = vld [vmem:[#allocation8 + $0xb0] sm:$0xf0] }
  0xef   :  { %1790 = vmatpush.bf16.msra.mxu0 %v3412_v29 }
  0xf1   :  { %1803 = vmatpush.bf16.msra.mxu1 %v3540_v32  ;;  %1816 = vmatpush.bf16.msra.mxu2 %v3668_v33  ;;  %v4055_v32 = vld [vmem:[#allocation8 + $0x160] sm:$0xf]  ;;  %v3928_v33 = vor.u32 %v4628_v31, %v3927_v30 }
  0xf2   :  { %1829 = vmatpush.bf16.msra.mxu3 %v3796_v37  ;;  %v4624_v37 = vld [vmem:[#allocation8 + $0x4c] sm:$0xf0] }
  0xf3   :  { %1791 = vmatpush.bf16.msra.mxu0 %v3396_v46  ;;  %v3912_v44 = vor.u32 %v4624_v37, %v3911_v36  ;;  %v4040_v46 = vor.u32 %v4656_v43, %v4039_v40  ;;  %v4626_v36 = vld [vmem:[#allocation8 + $0x64] sm:$0xf]  ;;  %v3929_v37 = vld [vmem:[#allocation8 + $0x70] sm:$0xf0] }
  0xf4   :  { %v4658_v40 = vld [vmem:[#allocation8 + $0x164] sm:$0xf]  ;;  %v4057_v43 = vld [vmem:[#allocation8 + $0x170] sm:$0xf0] }
  0xf5   :  { %1804 = vmatpush.bf16.msra.mxu1 %v3524_v48  ;;  %1817 = vmatpush.bf16.msra.mxu2 %v3652_v49  ;;  %v4620_v48 = vld [vmem:[#allocation8 + $0x2c] sm:$0xf0] }
  0xf6   :  { %1830 = vmatpush.bf16.msra.mxu3 %v3780_v54  ;;  %v3896_v52 = vor.u32 %v4620_v48, %v3895_v47  ;;  %v3879_v54 = vld [vmem:[#allocation8] sm:$0xf]  ;;  %v4060_v48 = vor.u32 %v4658_v40, %v4057_v43  ;;  %v4708_v40 = vld [vmem:[#allocation8 + $0x2ec] sm:$0xf0] }
  0xf7   :  { %1792 = vmatpush.bf16.msra.mxu0 %v3380_v61  ;;  %v1586_v29 = vpop.f32.mrf.mxu0  ;;  %v4674_v61 = vld [vmem:[#allocation8 + $0x1e4] sm:$0xf]  ;;  %v4375_v43 = vld [vmem:[#allocation8 + $0x3e0] sm:$0xf] }
  0xf8   :  { %v1587_v21 = vadd.f32 %v1586_v29, %v4991_v28  ;;  %v4666_v28 = vld [vmem:[#allocation8 + $0x1a4] sm:$0xf]  ;;  %v3945_v29 = vld [vmem:[#allocation8 + $0x90] sm:$0xf0] }
  0xf9   :  { %1805 = vmatpush.bf16.msra.mxu1 %v3508_v1  ;;  %1818 = vmatpush.bf16.msra.mxu2 %v3636_v2  ;;  %v3880_v1 = vor.u32 %v4616_v55, %v3879_v54  ;;  %v4008_v2 = vor.u32 %v4648_v58, %v4007_v56 }
  0xfa   :  { %1831 = vmatpush.bf16.msra.mxu3 %v3764_v3  ;;  %1793 = vmatmul.bf16.vlgmr.msra.gmra.mxu0 %v4947_v7  ;;  %v4632_v7 = vld [vmem:[#allocation8 + $0x8c] sm:$0xf0]  ;;  %v3996_v3 = vor.u32 %v4642_v59, %v3993_v22 }
  0xfb   :  { %2662 = vmatpush.bf16.msrb.mxu0 %v3992_v4  ;;  %v3944_v27 = vor.u32 %v4632_v7, %v3943_v24  ;;  %v4124_v4 = vor.u32 %v4674_v61, %v4121_v5  ;;  %v3964_v24 = vor.u32 %v4634_v14, %v3961_v15  ;;  %v4092_v7 = vor.u32 %v4666_v28, %v4089_v16  ;;  %v3897_v61 = vld [vmem:[#allocation8 + $0x30] sm:$0xf0]  ;;  %v3999_v28 = vld [vmem:[#allocation8 + $0xe8] sm:$0xf]  ;;  %v4645_v16 = vld [vmem:[#allocation8 + $0xf4] sm:$0xf0] }
  0xfc   :  { %1806 = vmatmul.bf16.vlgmr.msra.gmra.mxu1 %v4959_v41  ;;  %1819 = vmatmul.bf16.vlgmr.msra.gmra.mxu2 %v4961_v42  ;;  %v4072_v41 = vor.u32 %v4664_v26, %v4071_v25  ;;  %v1599_v42 = vpop.f32.mrf.mxu1  ;;  %v1846_v25 = vpack.i.b16 %v1842_v17, %v1842_v17  ;;  %v1849_v26 = vpack.i.b16 %v1843_v18, %v1843_v18 }
  0xfd   :  { %2675 = vmatpush.bf16.msrb.mxu1 %v4120_v6  ;;  %1832 = vmatmul.bf16.vlgmr.msra.gmra.mxu3 %v4957_v38  ;;  %v4660_v38 = vld [vmem:[#allocation8 + $0x16c] sm:$0xf0]  ;;  %v4638_v6 = vld [vmem:[#allocation8 + $0xc4] sm:$0xf]  ;;  %v1600_v11 = vadd.f32 %v1599_v42, %v1587_v21  ;;  %v4073_v42 = vld [vmem:[#allocation8 + $0x190] sm:$0xf0] }
  0xfe   :  { %v4056_v34 = vor.u32 %v4660_v38, %v4055_v32 }
  0xff   :  { %2663 = vmatpush.bf16.msrb.mxu0 %v3976_v12  ;;  %v1612_v35 = vpop.f32.mrf.mxu2  ;;  %v1588_v45 = vpop.f32.mrf.mxu0  ;;  %v3980_v12 = vor.u32 %v4638_v6, %v3977_v8  ;;  %v4614_v8 = vld [vmem:[#allocation8 + $0x4] sm:$0xf] }
 0x101   :  { %2676 = vmatpush.bf16.msrb.mxu1 %v4104_v13  ;;  %v4108_v13 = vor.u32 %v4670_v9, %v4105_v10  ;;  %v3881_v9 = vld [vmem:[#allocation8 + $0x10] sm:$0xf0] }
 0x102   :  { %v4997_v39 = vpop.f32.mrf.mxu3  ;;  %v3884_v18 = vor.u32 %v4614_v8, %v3881_v9  ;;  %v3919_v9 = vld [vmem:[#allocation8 + $0x48] sm:$0xf] }
 0x103   :  { %2664 = vmatpush.bf16.msrb.mxu0 %v3960_v20  ;;  %v1535_v20 = vadd.f32 %v4985_v62, %v4979_v63  ;;  %v1848_v62 = vperm.slane %v1846_v25, 0 }
 0x104   :  { %v1601_v49 = vpop.f32.mrf.mxu1 }
 0x105   :  { %2677 = vmatpush.bf16.msrb.mxu1 %v4088_v23  ;;  %v1613_v23 = vadd.f32 %v1612_v35, %v1600_v11  ;;  %v1548_v30 = vadd.f32 %v4987_v0, %v1535_v20  ;;  %v3932_v0 = vor.u32 %v4626_v36, %v3929_v37  ;;  %v4622_v49 = vld [vmem:[#allocation8 + $0x44] sm:$0xf]  ;;  %v4127_v20 = vld [vmem:[#allocation8 + $0x1e8] sm:$0xf]  ;;  %v4669_v36 = vld [vmem:[#allocation8 + $0x1b4] sm:$0xf0] }
 0x106   :  { %v3916_v56 = vor.u32 %v4622_v49, %v3913_v50  ;;  %v4247_v37 = vld [vmem:[#allocation8 + $0x2e0] sm:$0xf]  ;;  %v4079_v49 = vld [vmem:[#allocation8 + $0x188] sm:$0xf]  ;;  %v4665_v50 = vld [vmem:[#allocation8 + $0x194] sm:$0xf0] }
 0x107   :  { %2665 = vmatpush.bf16.msrb.mxu0 %v3944_v27  ;;  %v1614_v57 = vpop.f32.mrf.mxu2  ;;  %v4630_v27 = vld [vmem:[#allocation8 + $0x84] sm:$0xf]  ;;  %v1626_v31 = vadd.f32 %v4997_v39, %v1613_v23  ;;  %v1862_v39 = vunpack.c.l.bf16 %v1848_v62  ;;  %v4677_v23 = vld [vmem:[#allocation8 + $0x1f4] sm:$0xf0] }
 0x108   :  { %v3948_v38 = vor.u32 %v4630_v27, %v3945_v29  ;;  %v4000_v27 = vor.u32 %v4645_v16, %v3999_v28  ;;  %v4199_v28 = vld [vmem:[#allocation8 + $0x280] sm:$0xf]  ;;  %v4696_v16 = vld [vmem:[#allocation8 + $0x28c] sm:$0xf0] }
 0x109   :  { %2678 = vmatpush.bf16.msrb.mxu1 %v4072_v41  ;;  %v4662_v41 = vld [vmem:[#allocation8 + $0x184] sm:$0xf] }
 0x10a   :  { %v1627_v60 = vpop.f32.mrf.mxu3  ;;  %v4076_v35 = vor.u32 %v4662_v41, %v4073_v42  ;;  %v4128_v42 = vor.u32 %v4677_v23, %v4127_v20  ;;  %v4200_v20 = vor.u32 %v4696_v16, %v4199_v28  ;;  %v4728_v23 = vld [vmem:[#allocation8 + $0x38c] sm:$0xf0]  ;;  %v4263_v16 = vld [vmem:[#allocation8 + $0x300] sm:$0xf] }
 0x10b   :  { %2666 = vmatpush.bf16.msrb.mxu0 %v3928_v33  ;;  %v4618_v60 = vld [vmem:[#allocation8 + $0x24] sm:$0xf]  ;;  %v4680_v28 = vld [vmem:[#allocation8 + $0x20c] sm:$0xf0] }
 0x10d   :  { %2679 = vmatpush.bf16.msrb.mxu1 %v4056_v34  ;;  %v1851_v34 = vperm.slane %v1849_v26, 0 }
 0x10f   :  { %2667 = vmatpush.bf16.msrb.mxu0 %v3912_v44  ;;  %v1561_v44 = vadd.f32 %v4989_v19, %v1548_v30  ;;  %v1863_v47 = vunpack.c.l.bf16 %v1851_v34  ;;  %v3983_v30 = vld [vmem:[#allocation8 + $0xc8] sm:$0xf]  ;;  %v4637_v34 = vld [vmem:[#allocation8 + $0xb4] sm:$0xf0] }
 0x111   :  { %2680 = vmatpush.bf16.msrb.mxu1 %v4040_v46 }
 0x113   :  { %2668 = vmatpush.bf16.msrb.mxu0 %v3896_v52  ;;  %v4041_v52 = vld [vmem:[#allocation8 + $0x150] sm:$0xf0] }
 0x114   :  { %v4044_v22 = vor.u32 %v4654_v51, %v4041_v52  ;;  %v4231_v51 = vld [vmem:[#allocation8 + $0x2c0] sm:$0xf]  ;;  %v4704_v52 = vld [vmem:[#allocation8 + $0x2cc] sm:$0xf0] }
 0x115   :  { %2681 = vmatpush.bf16.msrb.mxu1 %v4024_v53 }
 0x117   :  { %2669 = vmatpush.bf16.msrb.mxu0 %v3880_v1  ;;  %v1638_v32 = vpop.f32.mrf.mxu0  ;;  %v4650_v1 = vld [vmem:[#allocation8 + $0x124] sm:$0xf] }
 0x118   :  { %v1639_v33 = vadd.f32 %v1638_v32, %v1626_v31  ;;  %v4641_v31 = vld [vmem:[#allocation8 + $0xd4] sm:$0xf0]  ;;  %v4111_v32 = vld [vmem:[#allocation8 + $0x1c8] sm:$0xf] }
 0x119   :  { %2682 = vmatpush.bf16.msrb.mxu1 %v4008_v2  ;;  %v1651_v63 = vpop.f32.mrf.mxu1  ;;  %v4025_v2 = vld [vmem:[#allocation8 + $0x130] sm:$0xf0] }
 0x11a   :  { %v1652_v45 = vadd.f32 %v1651_v63, %v1639_v33  ;;  %v4028_v6 = vor.u32 %v4650_v1, %v4025_v2  ;;  %v3984_v33 = vor.u32 %v4641_v31, %v3983_v30  ;;  %v3967_v63 = vld [vmem:[#allocation8 + $0xa8] sm:$0xf]  ;;  %v4215_v1 = vld [vmem:[#allocation8 + $0x2a0] sm:$0xf]  ;;  %v4700_v2 = vld [vmem:[#allocation8 + $0x2ac] sm:$0xf0] }
 0x11b   :  { %2714 = vmatpush.bf16.msra.mxu0 %v3996_v3  ;;  %v4653_v30 = vld [vmem:[#allocation8 + $0x134] sm:$0xf0] }
 0x11c   :  { %v1837_v46 = vpack.c.bf16 %v1652_v45, %v1561_v44  ;;  %v4248_v44 = vor.u32 %v4708_v40, %v4247_v37  ;;  %v4740_v45 = vld [vmem:[#allocation8 + $0x3ec] sm:$0xf0]  ;;  %v4617_v37 = vld [vmem:[#allocation8 + $0x14] sm:$0xf0]  ;;  %v4015_v40 = vld [vmem:[#allocation8 + $0x108] sm:$0xf] }
 0x11d   :  { %2727 = vmatpush.bf16.msra.mxu1 %v4124_v4  ;;  %v3900_v4 = vor.u32 %v4618_v60, %v3897_v61  ;;  %v4661_v60 = vld [vmem:[#allocation8 + $0x174] sm:$0xf0] }
 0x11e   :  { %v1858_v53 = vunpack.c.l.bf16 %v1837_v46  ;;  %v1859_v54 = vunpack.c.h.bf16 %v1837_v46  ;;  %v4376_v46 = vor.u32 %v4740_v45, %v4375_v43  ;;  %2688 = vmatpush.bf16.msrb.mxu2 %v4248_v44  ;;  %v4649_v45 = vld [vmem:[#allocation8 + $0x114] sm:$0xf0] }
 0x11f   :  { %2715 = vmatpush.bf16.msra.mxu0 %v3980_v12  ;;  %v1664_v55 = vpop.f32.mrf.mxu2  ;;  %v1640_v58 = vpop.f32.mrf.mxu0  ;;  %v4646_v12 = vld [vmem:[#allocation8 + $0x104] sm:$0xf] }
 0x120   :  { %v1866_v19 = vadd.f32 %v1862_v39, %v1858_v53  ;;  %v1867_v59 = vadd.f32 %v1863_v47, %v1859_v54  ;;  %v3951_v47 = vld [vmem:[#allocation8 + $0x88] sm:$0xf]  ;;  %2701 = vmatpush.bf16.msrb.mxu3 %v4376_v46  ;;  %v4359_v53 = vld [vmem:[#allocation8 + $0x3c0] sm:$0xf]  ;;  %v4080_v58 = vor.u32 %v4665_v50, %v4079_v49  ;;  %v4001_v46 = vld [vmem:[#allocation8 + $0xf8] sm:$0xf0] }
 0x121   :  { %2728 = vmatpush.bf16.msra.mxu1 %v4108_v13  ;;  %v1653_v21 = vpop.f32.mrf.mxu1  ;;  %v4009_v13 = vld [vmem:[#allocation8 + $0x110] sm:$0xf0]  ;;  %v4295_v49 = vld [vmem:[#allocation8 + $0x340] sm:$0xf]  ;;  %v4675_v50 = vld [vmem:[#allocation8 + $0x1ec] sm:$0xf] }
 0x122   :  { %v1677_v57 = vpop.f32.mrf.mxu3  ;;  %v1870_v3 = vpack.c.bf16 %v1867_v59, %v1866_v19  ;;  %v4629_v59 = vld [vmem:[#allocation8 + $0x74] sm:$0xf0] }
 0x123   :  { %2716 = vmatpush.bf16.msra.mxu0 %v3964_v24  ;;  %v5005_v5 = vadd.f32 %v1677_v57, %v1664_v55  ;;  %v3935_v55 = vld [vmem:[#allocation8 + $0x68] sm:$0xf]  ;;  %v4736_v57 = vld [vmem:[#allocation8 + $0x3cc] sm:$0xf0] }
 0x124   :  { %v1872_v10 = vunpack.c.l.bf16 %v1870_v3  ;;  %v1873_v11 = vunpack.c.h.bf16 %v1870_v3  ;;  %v4360_v61 = vor.u32 %v4736_v57, %v4359_v53  ;;  %v4343_v3 = vld [vmem:[#allocation8 + $0x3a0] sm:$0xf]  ;;  %v3936_v8 = vor.u32 %v4629_v59, %v3935_v55  ;;  %v4639_v59 = vld [vmem:[#allocation8 + $0xcc] sm:$0xf] }
 0x125   :  { %2729 = vmatpush.bf16.msra.mxu1 %v4092_v7  ;;  %v4012_v7 = vor.u32 %v4646_v12, %v4009_v13  ;;  %v4625_v12 = vld [vmem:[#allocation8 + $0x54] sm:$0xf0]  ;;  %v4047_v13 = vld [vmem:[#allocation8 + $0x148] sm:$0xf]  ;;  %v4016_v57 = vor.u32 %v4649_v45, %v4015_v40 }
 0x126   :  { %v1876_v14 = vmul.f32 0.20019531, %v1872_v10  ;;  %v1877_v15 = vmul.f32 0.20019531, %v1873_v11  ;;  %2702 = vmatpush.bf16.msrb.mxu3 %v4360_v61  ;;  %v4151_v61 = vld [vmem:[#allocation8 + $0x220] sm:$0xf] }
 0x127   :  { %2717 = vmatpush.bf16.msra.mxu0 %v3948_v38  ;;  %v1666_v17 = vpop.f32.mrf.mxu2  ;;  %v4673_v38 = vld [vmem:[#allocation8 + $0x1d4] sm:$0xf0] }
 0x128   :  { %v1886_v25 = vmax.f32 %v1872_v10, %v1876_v14  ;;  %v1887_v26 = vmax.f32 %v1873_v11, %v1877_v15  ;;  %v4112_v62 = vor.u32 %v4673_v38, %v4111_v32  ;;  %v4657_v14 = vld [vmem:[#allocation8 + $0x154] sm:$0xf0]  ;;  %v4327_v17 = vld [vmem:[#allocation8 + $0x380] sm:$0xf] }
 0x129   :  { %2730 = vmatpush.bf16.msra.mxu1 %v4076_v35  ;;  %v4095_v35 = vld [vmem:[#allocation8 + $0x1a8] sm:$0xf]  ;;  %v4183_v38 = vld [vmem:[#allocation8 + $0x260] sm:$0xf] }
 0x12a   :  { %v1679_v24 = vpop.f32.mrf.mxu3  ;;  %v5007_v29 = vpack.c.bf16 %v1886_v25, %v1886_v25  ;;  %v5009_v41 = vpack.c.bf16 %v1887_v26, %v1887_v26  ;;  %v4096_v39 = vor.u32 %v4669_v36, %v4095_v35  ;;  %v4328_v25 = vor.u32 %v4728_v23, %v4327_v17  ;;  %v3887_v36 = vld [vmem:[#allocation8 + $0x8] sm:$0xf]  ;;  %v4712_v23 = vld [vmem:[#allocation8 + $0x30c] sm:$0xf0] }
 0x12b   :  { %2718 = vmatpush.bf16.msra.mxu0 %v3932_v0  ;;  %v3968_v0 = vor.u32 %v4637_v34, %v3967_v63  ;;  %v3920_v24 = vor.u32 %v4625_v12, %v3919_v9  ;;  %v4048_v26 = vor.u32 %v4657_v14, %v4047_v13  ;;  %v4311_v63 = vld [vmem:[#allocation8 + $0x360] sm:$0xf]  ;;  %v4724_v34 = vld [vmem:[#allocation8 + $0x36c] sm:$0xf0]  ;;  %v3888_v55 = vor.u32 %v4617_v37, %v3887_v36  ;;  %v4635_v9 = vld [vmem:[#allocation8 + $0xac] sm:$0xf] }
 0x12c   :  { %2670 = vmatmul.bf16.vlgmr.msrb.gmra.mxu0 %v5007_v29  ;;  %2683 = vmatmul.bf16.vlgmr.msrb.gmra.mxu1 %v5009_v41  ;;  %v4312_v43 = vor.u32 %v4724_v34, %v4311_v63  ;;  %v4667_v13 = vld [vmem:[#allocation8 + $0x1ac] sm:$0xf]  ;;  %v4135_v14 = vld [vmem:[#allocation8 + $0x200] sm:$0xf]  ;;  %v3953_v63 = vld [vmem:[#allocation8 + $0x98] sm:$0xf0] }
 0x12d   :  { %2731 = vmatpush.bf16.msra.mxu1 %v4060_v48  ;;  %v4633_v48 = vld [vmem:[#allocation8 + $0x94] sm:$0xf0]  ;;  %v4081_v34 = vld [vmem:[#allocation8 + $0x198] sm:$0xf0]  ;;  %v4233_v36 = vld [vmem:[#allocation8 + $0x2d0] sm:$0xf0] }
 0x12e   :  { %v3952_v54 = vor.u32 %v4633_v48, %v3951_v47  ;;  %v4167_v47 = vld [vmem:[#allocation8 + $0x240] sm:$0xf]  ;;  %v4688_v48 = vld [vmem:[#allocation8 + $0x24c] sm:$0xf0]  ;;  %v4734_v37 = vld [vmem:[#allocation8 + $0x3c4] sm:$0xf] }
 0x12f   :  { %2719 = vmatpush.bf16.msra.mxu0 %v3916_v56  ;;  %v4232_v56 = vor.u32 %v4704_v52, %v4231_v51  ;;  %v4129_v51 = vld [vmem:[#allocation8 + $0x1f8] sm:$0xf0]  ;;  %v4168_v53 = vor.u32 %v4688_v48, %v4167_v47  ;;  %v4659_v48 = vld [vmem:[#allocation8 + $0x16c] sm:$0xf] }
 0x131   :  { %2732 = vmatpush.bf16.msra.mxu1 %v4044_v22  ;;  %v4063_v22 = vld [vmem:[#allocation8 + $0x168] sm:$0xf]  ;;  %2689 = vmatpush.bf16.msrb.mxu2 %v4232_v56 }
 0x132   :  { %v4064_v11 = vor.u32 %v4661_v60, %v4063_v22  ;;  %v3985_v22 = vld [vmem:[#allocation8 + $0xd8] sm:$0xf0]  ;;  %v4132_v60 = vor.u32 %v4675_v50, %v4129_v51  ;;  %v4698_v51 = vld [vmem:[#allocation8 + $0x2a4] sm:$0xf] }
 0x133   :  { %2720 = vmatpush.bf16.msra.mxu0 %v3900_v4  ;;  %v4216_v4 = vor.u32 %v4700_v2, %v4215_v1  ;;  %v4684_v1 = vld [vmem:[#allocation8 + $0x22c] sm:$0xf0]  ;;  %v4279_v2 = vld [vmem:[#allocation8 + $0x320] sm:$0xf]  ;;  %v3988_v12 = vor.u32 %v4639_v59, %v3985_v22  ;;  %v3921_v59 = vld [vmem:[#allocation8 + $0x58] sm:$0xf0] }
 0x135   :  { %2733 = vmatpush.bf16.msra.mxu1 %v4028_v6  ;;  %v4732_v6 = vld [vmem:[#allocation8 + $0x3ac] sm:$0xf0]  ;;  %2690 = vmatpush.bf16.msrb.mxu2 %v4216_v4  ;;  %v4113_v4 = vld [vmem:[#allocation8 + $0x1d8] sm:$0xf0] }
 0x136   :  { %v4344_v10 = vor.u32 %v4732_v6, %v4343_v3  ;;  %v4671_v3 = vld [vmem:[#allocation8 + $0x1cc] sm:$0xf]  ;;  %v4152_v6 = vor.u32 %v4684_v1, %v4151_v61  ;;  %v4049_v61 = vld [vmem:[#allocation8 + $0x158] sm:$0xf0]  ;;  %v4694_v1 = vld [vmem:[#allocation8 + $0x284] sm:$0xf] }
 0x137   :  { %2721 = vmatpush.bf16.msra.mxu0 %v3884_v18  ;;  %v5013_v19 = vpop.f32.mrf.mxu0  ;;  %v4116_v17 = vor.u32 %v4671_v3, %v4113_v4  ;;  %v4726_v3 = vld [vmem:[#allocation8 + $0x384] sm:$0xf] }
 0x138   :  { %2703 = vmatpush.bf16.msrb.mxu3 %v4344_v10  ;;  %v3969_v10 = vld [vmem:[#allocation8 + $0xb8] sm:$0xf0] }
 0x139   :  { %2734 = vmatpush.bf16.msra.mxu1 %v4012_v7  ;;  %v5015_v21 = vpop.f32.mrf.mxu1  ;;  %v3903_v7 = vld [vmem:[#allocation8 + $0x28] sm:$0xf]  ;;  %2691 = vmatpush.bf16.msrb.mxu2 %v4200_v20  ;;  %v4136_v20 = vor.u32 %v4680_v28, %v4135_v14  ;;  %v3905_v14 = vld [vmem:[#allocation8 + $0x38] sm:$0xf0] }
 0x13b   :  { %2766 = vmatpush.bf16.msrb.mxu0 %v4000_v27  ;;  %v4621_v27 = vld [vmem:[#allocation8 + $0x34] sm:$0xf0] }
 0x13c   :  { %2722 = vmatmul.bf16.vlgmr.msra.gmra.mxu0 %v5007_v29  ;;  %2735 = vmatmul.bf16.vlgmr.msra.gmra.mxu1 %v5009_v41  ;;  %v3904_v35 = vor.u32 %v4621_v27, %v3903_v7  ;;  %v4249_v7 = vld [vmem:[#allocation8 + $0x2f0] sm:$0xf0] }
 0x13d   :  { %2779 = vmatpush.bf16.msrb.mxu1 %v4128_v42  ;;  %v4031_v42 = vld [vmem:[#allocation8 + $0x128] sm:$0xf]  ;;  %2704 = vmatpush.bf16.msrb.mxu3 %v4328_v25  ;;  %v4097_v25 = vld [vmem:[#allocation8 + $0x1b8] sm:$0xf0] }
 0x13e   :  { %v4032_v44 = vor.u32 %v4653_v30, %v4031_v42  ;;  %v4738_v42 = vld [vmem:[#allocation8 + $0x3e4] sm:$0xf]  ;;  %v4377_v30 = vld [vmem:[#allocation8 + $0x3f0] sm:$0xf0] }
 0x13f   :  { %2767 = vmatpush.bf16.msrb.mxu0 %v3984_v33  ;;  %v5017_v15 = vpop.f32.mrf.mxu2  ;;  %v1692_v31 = vpop.f32.mrf.mxu0  ;;  %v4692_v33 = vld [vmem:[#allocation8 + $0x26c] sm:$0xf0] }
 0x140   :  { %v4380_v31 = vor.u32 %v4738_v42, %v4377_v30  ;;  %v4615_v30 = vld [vmem:[#allocation8 + $0xc] sm:$0xf] }
 0x141   :  { %2780 = vmatpush.bf16.msrb.mxu1 %v4112_v62  ;;  %v1705_v32 = vpop.f32.mrf.mxu1  ;;  %v4184_v62 = vor.u32 %v4692_v33, %v4183_v38  ;;  %2705 = vmatpush.bf16.msrb.mxu3 %v4312_v43  ;;  %v4100_v38 = vor.u32 %v4667_v13, %v4097_v25  ;;  %v4631_v33 = vld [vmem:[#allocation8 + $0x8c] sm:$0xf] }
 0x142   :  { %v5020_v18 = vpop.f32.mrf.mxu3  ;;  %v3972_v32 = vor.u32 %v4635_v9, %v3969_v10  ;;  %v3956_v40 = vor.u32 %v4631_v33, %v3953_v63  ;;  %v4329_v10 = vld [vmem:[#allocation8 + $0x390] sm:$0xf0]  ;;  %v4619_v13 = vld [vmem:[#allocation8 + $0x2c] sm:$0xf]  ;;  %v4017_v33 = vld [vmem:[#allocation8 + $0x118] sm:$0xf0] }
 0x143   :  { %2768 = vmatpush.bf16.msrb.mxu0 %v3968_v0  ;;  %v4643_v0 = vld [vmem:[#allocation8 + $0xec] sm:$0xf]  ;;  %2692 = vmatpush.bf16.msrb.mxu2 %v4184_v62  ;;  %v4332_v28 = vor.u32 %v4726_v3, %v4329_v10 }
 0x144   :  { %v4663_v62 = vld [vmem:[#allocation8 + $0x18c] sm:$0xf] }
 0x145   :  { %2781 = vmatpush.bf16.msrb.mxu1 %v4096_v39  ;;  %v1844_v63 = vld [vmem:[#allocation1 + $0x12] sm:$0xff] }
 0x146   :  { %v1852_v10 = vpack.i.b16 %v1844_v63, %v1844_v63  ;;  %v4741_v63 = vld [vmem:[#allocation8 + $0x3f4] sm:$0xf0] }
 0x147   :  { %2769 = vmatpush.bf16.msrb.mxu0 %v3952_v54  ;;  %v1718_v39 = vpop.f32.mrf.mxu2  ;;  %v4720_v54 = vld [vmem:[#allocation8 + $0x34c] sm:$0xf0]  ;;  %2693 = vmatpush.bf16.msrb.mxu2 %v4168_v53  ;;  %v4730_v53 = vld [vmem:[#allocation8 + $0x3a4] sm:$0xf] }
 0x148   :  { %v4296_v56 = vor.u32 %v4720_v54, %v4295_v49  ;;  %v3937_v39 = vld [vmem:[#allocation8 + $0x78] sm:$0xf0] }
 0x149   :  { %2782 = vmatpush.bf16.msrb.mxu1 %v4080_v58  ;;  %v4004_v58 = vor.u32 %v4643_v0, %v4001_v46  ;;  %v4084_v0 = vor.u32 %v4663_v62, %v4081_v34  ;;  %v4627_v46 = vld [vmem:[#allocation8 + $0x6c] sm:$0xf]  ;;  %v4065_v49 = vld [vmem:[#allocation8 + $0x178] sm:$0xf0]  ;;  %v1845_v62 = vld [vmem:[#allocation1 + $0x1b] sm:$0xff] }
 0x14a   :  { %v1731_v52 = vpop.f32.mrf.mxu3  ;;  %2706 = vmatpush.bf16.msrb.mxu3 %v4296_v56  ;;  %v3940_v54 = vor.u32 %v4627_v46, %v3937_v39  ;;  %v4345_v56 = vld [vmem:[#allocation8 + $0x3b0] sm:$0xf0]  ;;  %v4686_v34 = vld [vmem:[#allocation8 + $0x244] sm:$0xf] }
 0x14b   :  { %2770 = vmatpush.bf16.msrb.mxu0 %v3936_v8  ;;  %v4716_v8 = vld [vmem:[#allocation8 + $0x32c] sm:$0xf0]  ;;  %2694 = vmatpush.bf16.msrb.mxu2 %v4152_v6  ;;  %v4217_v52 = vld [vmem:[#allocation8 + $0x2b0] sm:$0xf0]  ;;  %v4348_v22 = vor.u32 %v4730_v53, %v4345_v56  ;;  %v4682_v39 = vld [vmem:[#allocation8 + $0x224] sm:$0xf] }
 0x14c   :  { %v4297_v46 = vld [vmem:[#allocation8 + $0x350] sm:$0xf0] }
 0x14d   :  { %2783 = vmatpush.bf16.msrb.mxu1 %v4064_v11  ;;  %v4280_v11 = vor.u32 %v4716_v8, %v4279_v2  ;;  %v4201_v2 = vld [vmem:[#allocation8 + $0x290] sm:$0xf0] }
 0x14e   :  { %v4204_v9 = vor.u32 %v4694_v1, %v4201_v2  ;;  %v4281_v53 = vld [vmem:[#allocation8 + $0x330] sm:$0xf0] }
 0x14f   :  { %2771 = vmatpush.bf16.msrb.mxu0 %v3920_v24  ;;  %v4706_v24 = vld [vmem:[#allocation8 + $0x2e4] sm:$0xf]  ;;  %2707 = vmatpush.bf16.msrb.mxu3 %v4280_v11  ;;  %v4137_v56 = vld [vmem:[#allocation8 + $0x210] sm:$0xf0] }
 0x150   :  { %v4252_v27 = vor.u32 %v4706_v24, %v4249_v7  ;;  %2695 = vmatpush.bf16.msrb.mxu2 %v4136_v20  ;;  %v4185_v24 = vld [vmem:[#allocation8 + $0x270] sm:$0xf0]  ;;  %v3908_v7 = vor.u32 %v4619_v13, %v3905_v14 }
 0x151   :  { %2784 = vmatpush.bf16.msrb.mxu1 %v4048_v26  ;;  %v4264_v26 = vor.u32 %v4712_v23, %v4263_v16  ;;  %v4651_v16 = vld [vmem:[#allocation8 + $0x12c] sm:$0xf]  ;;  %v4690_v23 = vld [vmem:[#allocation8 + $0x264] sm:$0xf] }
 0x152   :  { %v4188_v25 = vor.u32 %v4690_v23, %v4185_v24 }
 0x153   :  { %2772 = vmatpush.bf16.msrb.mxu0 %v3904_v35  ;;  %2708 = vmatpush.bf16.msrb.mxu3 %v4264_v26  ;;  %v4702_v35 = vld [vmem:[#allocation8 + $0x2c4] sm:$0xf] }
 0x154   :  { %2740 = vmatpush.bf16.msra.mxu2 %v4252_v27  ;;  %v4236_v43 = vor.u32 %v4702_v35, %v4233_v36  ;;  %v4722_v26 = vld [vmem:[#allocation8 + $0x364] sm:$0xf]  ;;  %v4313_v27 = vld [vmem:[#allocation8 + $0x370] sm:$0xf0] }
 0x155   :  { %2785 = vmatpush.bf16.msrb.mxu1 %v4032_v44  ;;  %v4361_v44 = vld [vmem:[#allocation8 + $0x3d0] sm:$0xf0]  ;;  %v4718_v36 = vld [vmem:[#allocation8 + $0x344] sm:$0xf] }
 0x156   :  { %v4364_v47 = vor.u32 %v4734_v37, %v4361_v44  ;;  %v4169_v35 = vld [vmem:[#allocation8 + $0x250] sm:$0xf0] }
 0x157   :  { %2773 = vmatpush.bf16.msrb.mxu0 %v3888_v55  ;;  %2753 = vmatpush.bf16.msra.mxu3 %v4380_v31  ;;  %v5025_v45 = vpop.f32.mrf.mxu0  ;;  %v4220_v55 = vor.u32 %v4698_v51, %v4217_v52  ;;  %v3889_v31 = vld [vmem:[#allocation8 + $0x18] sm:$0xf0]  ;;  %v2872_v44 = vld [vmem:[%s5069_s4] sm:$0xf]  ;;  %v4714_v51 = vld [vmem:[#allocation8 + $0x324] sm:$0xf] }
 0x158   :  { %2741 = vmatpush.bf16.msra.mxu2 %v4236_v43  ;;  %2874 = vst [vmem:[#allocation1] ss:$9 sm:$0xff] %v2872_v44  ;;  %v4367_v44 = vld [vmem:[#allocation8 + $0x3c8] sm:$0xf] }
 0x159   :  { %2786 = vmatpush.bf16.msrb.mxu1 %v4016_v57  ;;  %v5027_v50 = vpop.f32.mrf.mxu1  ;;  %v4068_v57 = vor.u32 %v4659_v48, %v4065_v49  ;;  %v4300_v48 = vor.u32 %v4718_v36, %v4297_v46  ;;  %v4153_v49 = vld [vmem:[#allocation8 + $0x230] sm:$0xf0]  ;;  %v4239_v36 = vld [vmem:[#allocation8 + $0x2c8] sm:$0xf] }
 0x15a   :  { %2774 = vmatmul.bf16.vlgmr.msrb.gmra.mxu0 %v5007_v29  ;;  %v4156_v52 = vor.u32 %v4682_v39, %v4153_v49  ;;  %v4351_v49 = vld [vmem:[#allocation8 + $0x3a8] sm:$0xf] }
 0x15b   :  { %2818 = vmatpush.bf16.msra.mxu0 %v4004_v58  ;;  %2754 = vmatpush.bf16.msra.mxu3 %v4364_v47  ;;  %v4623_v58 = vld [vmem:[#allocation8 + $0x4c] sm:$0xf] }
 0x15c   :  { %2787 = vmatmul.bf16.vlgmr.msrb.gmra.mxu1 %v5009_v41  ;;  %2742 = vmatpush.bf16.msra.mxu2 %v4220_v55  ;;  %v3924_v6 = vor.u32 %v4623_v58, %v3921_v59  ;;  %v4678_v55 = vld [vmem:[#allocation8 + $0x204] sm:$0xf]  ;;  %v4265_v58 = vld [vmem:[#allocation8 + $0x310] sm:$0xf0] }
 0x15d   :  { %2831 = vmatpush.bf16.msra.mxu1 %v4132_v60  ;;  %v4655_v60 = vld [vmem:[#allocation8 + $0x14c] sm:$0xf]  ;;  %v4140_v59 = vor.u32 %v4678_v55, %v4137_v56  ;;  %v4697_v55 = vld [vmem:[#allocation8 + $0x294] sm:$0xf0]  ;;  %v4335_v56 = vld [vmem:[#allocation8 + $0x388] sm:$0xf] }
 0x15e   :  { %v4052_v11 = vor.u32 %v4655_v60, %v4049_v61  ;;  %v1691_v60 = vadd.f32 %v5013_v19, %v5005_v5 }
 0x15f   :  { %2819 = vmatpush.bf16.msra.mxu0 %v3988_v12  ;;  %2755 = vmatpush.bf16.msra.mxu3 %v4348_v22  ;;  %v5029_v4 = vpop.f32.mrf.mxu2  ;;  %v1744_v12 = vpop.f32.mrf.mxu0 }
 0x160   :  { %2743 = vmatpush.bf16.msra.mxu2 %v4204_v9  ;;  %v1769_v61 = vadd.f32 %v5029_v4, %v5027_v50  ;;  %v1704_v1 = vadd.f32 %v5015_v21, %v1691_v60  ;;  %v1854_v50 = vperm.slane %v1852_v10, 0  ;;  %v4693_v60 = vld [vmem:[#allocation8 + $0x274] sm:$0xf0] }
 0x161   :  { %2832 = vmatpush.bf16.msra.mxu1 %v4116_v17  ;;  %v4033_v17 = vld [vmem:[#allocation8 + $0x138] sm:$0xf0]  ;;  %v1757_v20 = vpop.f32.mrf.mxu1  ;;  %v4721_v10 = vld [vmem:[#allocation8 + $0x354] sm:$0xf0] }
 0x162   :  { %v5031_v8 = vpop.f32.mrf.mxu3  ;;  %v4036_v42 = vor.u32 %v4651_v16, %v4033_v17  ;;  %v1864_v17 = vunpack.c.l.bf16 %v1854_v50 }
 0x163   :  { %2820 = vmatpush.bf16.msra.mxu0 %v3972_v32  ;;  %2756 = vmatpush.bf16.msra.mxu3 %v4332_v28  ;;  %v4647_v32 = vld [vmem:[#allocation8 + $0x10c] sm:$0xf]  ;;  %v1782_v2 = vadd.f32 %v5031_v8, %v1769_v61  ;;  %v4319_v61 = vld [vmem:[#allocation8 + $0x368] sm:$0xf] }
 0x164   :  { %2744 = vmatpush.bf16.msra.mxu2 %v4188_v25  ;;  %v4020_v47 = vor.u32 %v4647_v32, %v4017_v33  ;;  %v4383_v33 = vld [vmem:[#allocation8 + $0x3e8] sm:$0xf] }
 0x165   :  { %2833 = vmatpush.bf16.msra.mxu1 %v4100_v38  ;;  %v4316_v38 = vor.u32 %v4722_v26, %v4313_v27 }
 0x167   :  { %2821 = vmatpush.bf16.msra.mxu0 %v3956_v40  ;;  %2757 = vmatpush.bf16.msra.mxu3 %v4316_v38  ;;  %v1770_v37 = vpop.f32.mrf.mxu2  ;;  %v3892_v40 = vor.u32 %v4615_v30, %v3889_v31  ;;  %v4255_v30 = vld [vmem:[#allocation8 + $0x2e8] sm:$0xf]  ;;  %v4709_v31 = vld [vmem:[#allocation8 + $0x2f4] sm:$0xf0] }
 0x169   :  { %2834 = vmatpush.bf16.msra.mxu1 %v4084_v0  ;;  %v4172_v0 = vor.u32 %v4686_v34, %v4169_v35  ;;  %v4256_v34 = vor.u32 %v4709_v31, %v4255_v30  ;;  %v4384_v35 = vor.u32 %v4741_v63, %v4383_v33  ;;  %v4699_v33 = vld [vmem:[#allocation8 + $0x2ac] sm:$0xf] }
 0x16a   :  { %v1783_v43 = vpop.f32.mrf.mxu3 }
 0x16b   :  { %2822 = vmatpush.bf16.msra.mxu0 %v3940_v54  ;;  %2745 = vmatpush.bf16.msra.mxu2 %v4172_v0  ;;  %v4284_v54 = vor.u32 %v4714_v51, %v4281_v53  ;;  %v4705_v43 = vld [vmem:[#allocation8 + $0x2d4] sm:$0xf0] }
 0x16c   :  { %2758 = vmatpush.bf16.msra.mxu3 %v4300_v48  ;;  %v4737_v0 = vld [vmem:[#allocation8 + $0x3d4] sm:$0xf0]  ;;  %v4240_v46 = vor.u32 %v4705_v43, %v4239_v36  ;;  %v4695_v43 = vld [vmem:[#allocation8 + $0x28c] sm:$0xf] }
 0x16d   :  { %2835 = vmatpush.bf16.msra.mxu1 %v4068_v57  ;;  %v4710_v57 = vld [vmem:[#allocation8 + $0x304] sm:$0xf]  ;;  %v4368_v39 = vor.u32 %v4737_v0, %v4367_v44  ;;  %v4701_v48 = vld [vmem:[#allocation8 + $0x2b4] sm:$0xf0]  ;;  %v4209_v44 = vld [vmem:[#allocation8 + $0x298] sm:$0xf0] }
 0x16e   :  { %v4268_v22 = vor.u32 %v4710_v57, %v4265_v58  ;;  %v4733_v51 = vld [vmem:[#allocation8 + $0x3b4] sm:$0xf0]  ;;  %v4727_v0 = vld [vmem:[#allocation8 + $0x38c] sm:$0xf] }
 0x16f   :  { %2823 = vmatpush.bf16.msra.mxu0 %v3924_v6  ;;  %2746 = vmatpush.bf16.msra.mxu2 %v4156_v52  ;;  %v4352_v53 = vor.u32 %v4733_v51, %v4351_v49  ;;  %v4729_v57 = vld [vmem:[#allocation8 + $0x394] sm:$0xf0]  ;;  %v4691_v51 = vld [vmem:[#allocation8 + $0x26c] sm:$0xf] }
 0x170   :  { %2759 = vmatpush.bf16.msra.mxu3 %v4284_v54  ;;  %v4207_v54 = vld [vmem:[#allocation8 + $0x288] sm:$0xf] }
 0x171   :  { %2836 = vmatpush.bf16.msra.mxu1 %v4052_v11  ;;  %v1855_v11 = vpack.i.b16 %v1845_v62, %v1845_v62  ;;  %v4208_v58 = vor.u32 %v4697_v55, %v4207_v54  ;;  %v4321_v54 = vld [vmem:[#allocation8 + $0x378] sm:$0xf0] }
 0x173   :  { %2824 = vmatpush.bf16.msra.mxu0 %v3908_v7  ;;  %2747 = vmatpush.bf16.msra.mxu2 %v4140_v59  ;;  %v1857_v4 = vperm.slane %v1855_v11, 0  ;;  %v4336_v59 = vor.u32 %v4729_v57, %v4335_v56  ;;  %v4687_v57 = vld [vmem:[#allocation8 + $0x24c] sm:$0xf] }
 0x174   :  { %2760 = vmatpush.bf16.msra.mxu3 %v4268_v22  ;;  %v4191_v22 = vld [vmem:[#allocation8 + $0x268] sm:$0xf] }
 0x175   :  { %2837 = vmatpush.bf16.msra.mxu1 %v4036_v42  ;;  %v1865_v20 = vunpack.c.l.bf16 %v1857_v4 }
 0x177   :  { %2825 = vmatpush.bf16.msra.mxu0 %v3892_v40  ;;  %v1794_v3 = vpop.f32.mrf.mxu0 }
 0x178   :  { %v1795_v9 = vadd.f32 %v1794_v3, %v1782_v2  ;;  %v4192_v2 = vor.u32 %v4693_v60, %v4191_v22  ;;  %v4305_v22 = vld [vmem:[#allocation8 + $0x358] sm:$0xf0] }
 0x179   :  { %2838 = vmatpush.bf16.msra.mxu1 %v4020_v47  ;;  %v1807_v6 = vpop.f32.mrf.mxu1  ;;  %v4223_v47 = vld [vmem:[#allocation8 + $0x2a8] sm:$0xf] }
 0x17a   :  { %2826 = vmatmul.bf16.vlgmr.msra.gmra.mxu0 %v5007_v29  ;;  %v1717_v29 = vadd.f32 %v5017_v15, %v1704_v1  ;;  %v4224_v52 = vor.u32 %v4701_v48, %v4223_v47  ;;  %v4725_v1 = vld [vmem:[#allocation8 + $0x374] sm:$0xf0]  ;;  %v4212_v48 = vor.u32 %v4695_v43, %v4209_v44  ;;  %v2876_v43 = vld [vmem:[#allocation1 + $0x9] sm:$0xff] }
 0x17b   :  { %v4320_v3 = vor.u32 %v4725_v1, %v4319_v61 }
 0x17c   :  { %2839 = vmatmul.bf16.vlgmr.msra.gmra.mxu1 %v5009_v41  ;;  %v1808_v41 = vadd.f32 %v1807_v6, %v1795_v9  ;;  %v1730_v5 = vadd.f32 %v5020_v18, %v1717_v29  ;;  %v4175_v6 = vld [vmem:[#allocation8 + $0x248] sm:$0xf]  ;;  %v4689_v9 = vld [vmem:[#allocation8 + $0x254] sm:$0xf0] }
 0x17d   :  { %v4303_v29 = vld [vmem:[#allocation8 + $0x348] sm:$0xf]  ;;  %v4176_v11 = vor.u32 %v4689_v9, %v4175_v6  ;;  %v4161_v9 = vld [vmem:[#allocation8 + $0x238] sm:$0xf0] }
 0x17e   :  { %v1743_v21 = vadd.f32 %v5025_v45, %v1730_v5  ;;  %v4685_v5 = vld [vmem:[#allocation8 + $0x234] sm:$0xf0] }
 0x17f   :  { %v1820_v12 = vpop.f32.mrf.mxu2  ;;  %v1796_v14 = vpop.f32.mrf.mxu0 }
 0x180   :  { %v1821_v19 = vadd.f32 %v1820_v12, %v1808_v41  ;;  %v1833_v13 = vpop.f32.mrf.mxu3  ;;  %v4304_v41 = vor.u32 %v4721_v10, %v4303_v29  ;;  %v4159_v12 = vld [vmem:[#allocation8 + $0x228] sm:$0xf]  ;;  %v4715_v29 = vld [vmem:[#allocation8 + $0x32c] sm:$0xf]  ;;  %v4289_v10 = vld [vmem:[#allocation8 + $0x338] sm:$0xf0] }
 0x181   :  { %v1809_v28 = vpop.f32.mrf.mxu1  ;;  %v4160_v50 = vor.u32 %v4685_v5, %v4159_v12  ;;  %v4143_v14 = vld [vmem:[#allocation8 + $0x208] sm:$0xf]  ;;  %v4679_v12 = vld [vmem:[#allocation8 + $0x20c] sm:$0xf]  ;;  %v4145_v5 = vld [vmem:[#allocation8 + $0x218] sm:$0xf0] }
 0x182   :  { %v1834_v8 = vadd.f32 %v1833_v13, %v1821_v19  ;;  %v4287_v19 = vld [vmem:[#allocation8 + $0x328] sm:$0xf]  ;;  %v4717_v13 = vld [vmem:[#allocation8 + $0x334] sm:$0xf0] }
 0x183   :  { %v4288_v4 = vor.u32 %v4717_v13, %v4287_v19  ;;  %v4681_v28 = vld [vmem:[#allocation8 + $0x214] sm:$0xf0]  ;;  %v4711_v19 = vld [vmem:[#allocation8 + $0x30c] sm:$0xf]  ;;  %v4273_v13 = vld [vmem:[#allocation8 + $0x318] sm:$0xf0] }
 0x184   :  { %v1838_v16 = vpack.c.bf16 %v1834_v8, %v1743_v21  ;;  %v4271_v21 = vld [vmem:[#allocation8 + $0x308] sm:$0xf]  ;;  %v4713_v8 = vld [vmem:[#allocation8 + $0x314] sm:$0xf0] }
 0x186   :  { %v1860_v23 = vunpack.c.l.bf16 %v1838_v16  ;;  %v1861_v15 = vunpack.c.h.bf16 %v1838_v16  ;;  %v4707_v16 = vld [vmem:[#allocation8 + $0x2ec] sm:$0xf] }
 0x187   :  { %v1822_v24 = vpop.f32.mrf.mxu2 }
 0x188   :  { %v1868_v7 = vadd.f32 %v1864_v17, %v1860_v23  ;;  %v1869_v25 = vadd.f32 %v1865_v20, %v1861_v15  ;;  %v1835_v26 = vpop.f32.mrf.mxu3  ;;  %v4257_v17 = vld [vmem:[#allocation8 + $0x2f8] sm:$0xf0]  ;;  %v4739_v20 = vld [vmem:[#allocation8 + $0x3ec] sm:$0xf]  ;;  %v4144_v15 = vor.u32 %v4681_v28, %v4143_v14  ;;  %v4272_v24 = vor.u32 %v4713_v8, %v4271_v21 }
 0x189   :  { %v4385_v23 = vld [vmem:[#allocation8 + $0x3f8] sm:$0xf0]  ;;  %v4703_v26 = vld [vmem:[#allocation8 + $0x2cc] sm:$0xf]  ;;  %v4148_v14 = vor.u32 %v4679_v12, %v4145_v5  ;;  %v4276_v28 = vor.u32 %v4711_v19, %v4273_v13 }
 0x18a   :  { %v1871_v27 = vpack.c.bf16 %v1869_v25, %v1868_v7  ;;  %v4260_v7 = vor.u32 %v4707_v16, %v4257_v17  ;;  %v4388_v25 = vor.u32 %v4739_v20, %v4385_v23 }
 0x18c   :  { %v1874_v18 = vunpack.c.l.bf16 %v1871_v27  ;;  %v1875_v42 = vunpack.c.h.bf16 %v1871_v27  ;;  %v4241_v27 = vld [vmem:[#allocation8 + $0x2d8] sm:$0xf0] }
 0x18e   :  { %v1878_v32 = vmul.f32 0.20019531, %v1874_v18  ;;  %v1879_v38 = vmul.f32 0.20019531, %v1875_v42 }
 0x190   :  { %v1888_v45 = vmax.f32 %v1874_v18, %v1878_v32  ;;  %v1889_v62 = vmax.f32 %v1875_v42, %v1879_v38  ;;  %v4735_v18 = vld [vmem:[#allocation8 + $0x3cc] sm:$0xf]  ;;  %v4369_v42 = vld [vmem:[#allocation8 + $0x3d8] sm:$0xf0]  ;;  %v4244_v32 = vor.u32 %v4703_v26, %v4241_v27 }
 0x191   :  { %v4372_v38 = vor.u32 %v4735_v18, %v4369_v42 }
 0x192   :  { %v5047_v37 = vpack.c.bf16 %v1888_v45, %v1888_v45  ;;  %v5049_v40 = vpack.c.bf16 %v1889_v62, %v1889_v62  ;;  %v4225_v45 = vld [vmem:[#allocation8 + $0x2b8] sm:$0xf0]  ;;  %v4731_v62 = vld [vmem:[#allocation8 + $0x3ac] sm:$0xf] }
 0x194   :  { %2696 = vmatmul.bf16.vlgmr.msrb.gmra.mxu2 %v5047_v37  ;;  %2709 = vmatmul.bf16.vlgmr.msrb.gmra.mxu3 %v5049_v40 }
 0x195   :  { %2792 = vmatpush.bf16.msrb.mxu2 %v4256_v34  ;;  %2805 = vmatpush.bf16.msrb.mxu3 %v4384_v35  ;;  %v4353_v34 = vld [vmem:[#allocation8 + $0x3b8] sm:$0xf0]  ;;  %v4228_v35 = vor.u32 %v4699_v33, %v4225_v45 }
 0x196   :  { %v4356_v36 = vor.u32 %v4731_v62, %v4353_v34 }
 0x199   :  { %2793 = vmatpush.bf16.msrb.mxu2 %v4240_v46  ;;  %2806 = vmatpush.bf16.msrb.mxu3 %v4368_v39  ;;  %v4337_v46 = vld [vmem:[#allocation8 + $0x398] sm:$0xf0] }
 0x19a   :  { %v4340_v49 = vor.u32 %v4727_v0, %v4337_v46  ;;  %v2882_v0 = vpack.i.b16 %v2876_v43, %v2876_v43 }
 0x19d   :  { %2794 = vmatpush.bf16.msrb.mxu2 %v4224_v52  ;;  %2807 = vmatpush.bf16.msrb.mxu3 %v4352_v53  ;;  %v4193_v52 = vld [vmem:[#allocation8 + $0x278] sm:$0xf0]  ;;  %v4723_v53 = vld [vmem:[#allocation8 + $0x36c] sm:$0xf] }
 0x19e   :  { %v4196_v55 = vor.u32 %v4691_v51, %v4193_v52  ;;  %v4324_v56 = vor.u32 %v4723_v53, %v4321_v54 }
 0x1a1   :  { %2795 = vmatpush.bf16.msrb.mxu2 %v4208_v58  ;;  %2808 = vmatpush.bf16.msrb.mxu3 %v4336_v59  ;;  %v4177_v58 = vld [vmem:[#allocation8 + $0x258] sm:$0xf0]  ;;  %v4719_v59 = vld [vmem:[#allocation8 + $0x34c] sm:$0xf] }
 0x1a2   :  { %v4180_v1 = vor.u32 %v4687_v57, %v4177_v58 }
 0x1a4   :  { %2748 = vmatmul.bf16.vlgmr.msra.gmra.mxu2 %v5047_v37  ;;  %2761 = vmatmul.bf16.vlgmr.msra.gmra.mxu3 %v5049_v40 }
 0x1a5   :  { %2796 = vmatpush.bf16.msrb.mxu2 %v4192_v2  ;;  %2809 = vmatpush.bf16.msrb.mxu3 %v4320_v3  ;;  %v4308_v2 = vor.u32 %v4719_v59, %v4305_v22  ;;  %v4683_v3 = vld [vmem:[#allocation8 + $0x22c] sm:$0xf] }
 0x1a9   :  { %2797 = vmatpush.bf16.msrb.mxu2 %v4176_v11  ;;  %2810 = vmatpush.bf16.msrb.mxu3 %v4304_v41  ;;  %v2671_v30 = vpop.f32.mrf.mxu0  ;;  %v2684_v31 = vpop.f32.mrf.mxu1  ;;  %v4164_v11 = vor.u32 %v4683_v3, %v4161_v9  ;;  %v4292_v41 = vor.u32 %v4715_v29, %v4289_v10 }
 0x1aa   :  { %v5055_v63 = vadd.f32 %v2684_v31, %v2671_v30 }
 0x1ad   :  { %2798 = vmatpush.bf16.msrb.mxu2 %v4160_v50  ;;  %2811 = vmatpush.bf16.msrb.mxu3 %v4288_v4 }
 0x1b1   :  { %2799 = vmatpush.bf16.msrb.mxu2 %v4144_v15  ;;  %2812 = vmatpush.bf16.msrb.mxu3 %v4272_v24  ;;  %v2673_v39 = vpop.f32.mrf.mxu0  ;;  %v2686_v47 = vpop.f32.mrf.mxu1 }
 0x1b4   :  { %2800 = vmatmul.bf16.vlgmr.msrb.gmra.mxu2 %v5047_v37  ;;  %2813 = vmatmul.bf16.vlgmr.msrb.gmra.mxu3 %v5049_v40 }
 0x1b5   :  { %2844 = vmatpush.bf16.msra.mxu2 %v4260_v7  ;;  %2857 = vmatpush.bf16.msra.mxu3 %v4388_v25 }
 0x1b9   :  { %2845 = vmatpush.bf16.msra.mxu2 %v4244_v32  ;;  %2858 = vmatpush.bf16.msra.mxu3 %v4372_v38  ;;  %v2723_v60 = vpop.f32.mrf.mxu0  ;;  %v2736_v61 = vpop.f32.mrf.mxu1 }
 0x1ba   :  { %v2737_v6 = vadd.f32 %v2736_v61, %v2723_v60 }
 0x1bd   :  { %2846 = vmatpush.bf16.msra.mxu2 %v4228_v35  ;;  %2859 = vmatpush.bf16.msra.mxu3 %v4356_v36  ;;  %v2875_v36 = vld [vmem:[#allocation1] sm:$0xff] }
 0x1be   :  { %v2879_v44 = vpack.i.b16 %v2875_v36, %v2875_v36 }
 0x1c0   :  { %v2881_v47 = vperm.slane %v2879_v44, 0 }
 0x1c1   :  { %2847 = vmatpush.bf16.msra.mxu2 %v4212_v48  ;;  %2860 = vmatpush.bf16.msra.mxu3 %v4340_v49  ;;  %v2725_v50 = vpop.f32.mrf.mxu0  ;;  %v2738_v4 = vpop.f32.mrf.mxu1  ;;  %v2884_v48 = vperm.slane %v2882_v0, 0  ;;  %v4749_v0 = vld [vmem:[#allocation2] ss:$0 sm:$0xff] }
 0x1c2   :  { %v2895_v51 = vunpack.c.l.bf16 %v2881_v47 }
 0x1c3   :  { %v2896_v52 = vunpack.c.l.bf16 %v2884_v48 }
 0x1c5   :  { %2848 = vmatpush.bf16.msra.mxu2 %v4196_v55  ;;  %2861 = vmatpush.bf16.msra.mxu3 %v4324_v56  ;;  %v2877_v55 = vld [vmem:[#allocation1 + $0x12] sm:$0xff]  ;;  %v2878_v56 = vld [vmem:[#allocation1 + $0x1b] sm:$0xff] }
 0x1c6   :  { %v2885_v58 = vpack.i.b16 %v2877_v55, %v2877_v55  ;;  %v2888_v59 = vpack.i.b16 %v2878_v56, %v2878_v56 }
 0x1c8   :  { %v2890_v9 = vperm.slane %v2888_v59, 0 }
 0x1c9   :  { %2849 = vmatpush.bf16.msra.mxu2 %v4180_v1  ;;  %2862 = vmatpush.bf16.msra.mxu3 %v4308_v2 }
 0x1ca   :  { %v2898_v19 = vunpack.c.l.bf16 %v2890_v9 }
 0x1cd   :  { %2850 = vmatpush.bf16.msra.mxu2 %v4164_v11  ;;  %2863 = vmatpush.bf16.msra.mxu3 %v4292_v41 }
 0x1d1   :  { %2851 = vmatpush.bf16.msra.mxu2 %v4148_v14  ;;  %2864 = vmatpush.bf16.msra.mxu3 %v4276_v28 }
 0x1d4   :  { %2852 = vmatmul.bf16.vlgmr.msra.gmra.mxu2 %v5047_v37  ;;  %2865 = vmatmul.bf16.vlgmr.msra.gmra.mxu3 %v5049_v40 }
 0x1d7   :  { %v2775_v21 = vpop.f32.mrf.mxu0 }
 0x1d9   :  { %v2788_v8 = vpop.f32.mrf.mxu1 }
 0x1da   :  { %v2789_v16 = vadd.f32 %v2788_v8, %v2775_v21 }
 0x1df   :  { %v2777_v17 = vpop.f32.mrf.mxu0 }
 0x1e1   :  { %v2790_v20 = vpop.f32.mrf.mxu1 }
 0x1f7   :  { %v2827_v23 = vpop.f32.mrf.mxu0 }
 0x1f9   :  { %v2840_v15 = vpop.f32.mrf.mxu1 }
 0x1fa   :  { %v2841_v24 = vadd.f32 %v2840_v15, %v2827_v23  ;;  %v2929_v23 = vld [vmem:[#allocation10] sm:$0xf] }
 0x1ff   :  { %v2829_v7 = vpop.f32.mrf.mxu0 }
 0x200   :  { %v2931_v7 = vperm.slane %v2929_v23, 0 }
 0x201   :  { %v2842_v25 = vpop.f32.mrf.mxu1 }
 0x202   :  { %v2932_v25 = vperm.slane %v2929_v23, 1 }
 0x217   :  { %v2697_v26 = vpop.f32.mrf.mxu2  ;;  %v2710_v27 = vpop.f32.mrf.mxu3 }
 0x218   :  { %v2698_v30 = vadd.f32 %v2697_v26, %v5055_v63 }
 0x21a   :  { %v2711_v40 = vadd.f32 %v2710_v27, %v2698_v30 }
 0x21f   :  { %v2699_v18 = vpop.f32.mrf.mxu2  ;;  %v2712_v42 = vpop.f32.mrf.mxu3 }
 0x227   :  { %v2749_v31 = vpop.f32.mrf.mxu2  ;;  %v2762_v37 = vpop.f32.mrf.mxu3 }
 0x228   :  { %v2750_v32 = vadd.f32 %v2749_v31, %v2737_v6  ;;  %v2887_v6 = vperm.slane %v2885_v58, 0 }
 0x22a   :  { %v2763_v38 = vadd.f32 %v2762_v37, %v2750_v32  ;;  %v2897_v5 = vunpack.c.l.bf16 %v2887_v6  ;;  %v2933_v32 = vperm.slane %v2929_v23, 2 }
 0x22c   :  { %v2870_v33 = vpack.c.bf16 %v2763_v38, %v2711_v40 }
 0x22e   :  { %v2891_v49 = vunpack.c.l.bf16 %v2870_v33  ;;  %v2892_v63 = vunpack.c.h.bf16 %v2870_v33 }
 0x22f   :  { %v2751_v45 = vpop.f32.mrf.mxu2  ;;  %v2764_v62 = vpop.f32.mrf.mxu3 }
 0x230   :  { %v2899_v53 = vadd.f32 %v2895_v51, %v2891_v49  ;;  %v2900_v54 = vadd.f32 %v2896_v52, %v2892_v63  ;;  %v2934_v62 = vperm.slane %v2929_v23, 3 }
 0x232   :  { %v2903_v57 = vpack.c.bf16 %v2900_v54, %v2899_v53 }
 0x234   :  { %v2905_v22 = vunpack.c.l.bf16 %v2903_v57  ;;  %v2906_v60 = vunpack.c.h.bf16 %v2903_v57 }
 0x236   :  { %v2909_v29 = vmul.f32 0.20019531, %v2905_v22  ;;  %v2910_v10 = vmul.f32 0.20019531, %v2906_v60 }
 0x237   :  { %v2801_v34 = vpop.f32.mrf.mxu2  ;;  %v2814_v35 = vpop.f32.mrf.mxu3 }
 0x238   :  { %v2802_v61 = vadd.f32 %v2801_v34, %v2789_v16  ;;  %v2919_v4 = vmax.f32 %v2905_v22, %v2909_v29  ;;  %v2920_v14 = vmax.f32 %v2906_v60, %v2910_v10 }
 0x23a   :  { %v2815_v11 = vadd.f32 %v2814_v35, %v2802_v61  ;;  %v2923_v20 = vpack.c.bf16 %v2920_v14, %v2919_v4 }
 0x23c   :  { %v2925_v18 = vunpack.c.l.bf16 %v2923_v20  ;;  %v2926_v42 = vunpack.c.h.bf16 %v2923_v20 }
 0x23e   :  { %v2939_v40 = vmul.f32 %v2931_v7, %v2925_v18  ;;  %v2940_v38 = vmul.f32 %v2932_v25, %v2926_v42 }
 0x23f   :  { %v2803_v46 = vpop.f32.mrf.mxu2  ;;  %v2816_v39 = vpop.f32.mrf.mxu3 }
 0x240   :  { %v2943_v35 = vadd.f32 %v2940_v38, %v2939_v40 }
 0x257   :  { %v2853_v1 = vpop.f32.mrf.mxu2  ;;  %v2866_v2 = vpop.f32.mrf.mxu3 }
 0x258   :  { %v2854_v3 = vadd.f32 %v2853_v1, %v2841_v24 }
 0x25a   :  { %v2867_v41 = vadd.f32 %v2866_v2, %v2854_v3 }
 0x25c   :  { %v2871_v12 = vpack.c.bf16 %v2867_v41, %v2815_v11 }
 0x25e   :  { %v2893_v13 = vunpack.c.l.bf16 %v2871_v12  ;;  %v2894_v50 = vunpack.c.h.bf16 %v2871_v12 }
 0x25f   :  { %v2855_v28 = vpop.f32.mrf.mxu2  ;;  %v2868_v21 = vpop.f32.mrf.mxu3 }
 0x260   :  { %v2901_v8 = vadd.f32 %v2897_v5, %v2893_v13  ;;  %v2902_v16 = vadd.f32 %v2898_v19, %v2894_v50 }
 0x262   :  { %v2904_v17 = vpack.c.bf16 %v2902_v16, %v2901_v8 }
 0x264   :  { %v2907_v15 = vunpack.c.l.bf16 %v2904_v17  ;;  %v2908_v24 = vunpack.c.h.bf16 %v2904_v17 }
 0x266   :  { %v2911_v26 = vmul.f32 0.20019531, %v2907_v15  ;;  %v2912_v27 = vmul.f32 0.20019531, %v2908_v24 }
 0x268   :  { %v2921_v30 = vmax.f32 %v2907_v15, %v2911_v26  ;;  %v2922_v31 = vmax.f32 %v2908_v24, %v2912_v27 }
 0x26a   :  { %v2924_v37 = vpack.c.bf16 %v2922_v31, %v2921_v30 }
 0x26c   :  { %v2927_v33 = vunpack.c.l.bf16 %v2924_v37  ;;  %v2928_v45 = vunpack.c.h.bf16 %v2924_v37 }
 0x26e   :  { %v2941_v34 = vmul.f32 %v2933_v32, %v2927_v33  ;;  %v2942_v36 = vmul.f32 %v2934_v62, %v2928_v45 }
 0x270   :  { %v2944_v43 = vadd.f32 %v2943_v35, %v2941_v34 }
 0x272   :  { %v2945_v44 = vadd.f32 %v2944_v43, %v2942_v36 }
 0x274   :  { %2946 = vadd.xlane.f32.xlu0 %v2945_v44 }
 0x2e7   :  { %v2947_v46 = vpop.xlane.xlu0 %2946 }
 0x2e8   :  { %v2952_v39 = vadd.f32 %v4749_v0, %v2947_v46 }
 0x2ea   :  { %v4389_v47 = vmul.f32 -1.442695, %v2952_v39 }
 0x2ec   :  { %4750 = vpow2.f32 %v4389_v47 }
 0x2f2   :  { %v4751_v48 = vpop.eup %4750 }
 0x2f3   :  { %v2956_v49 = vadd.f32 1.0, %v4751_v48 }
 0x2f5   :  { %4752 = vrcp.f32 %v2956_v49  ;;  %v2968_v53 = vand.u32 2147483648, %v2956_v49  ;;  %v2966_v55 = vand.u32 2147483647, %v2956_v49  ;;  %vm2962_vm1 = vweird.f32 %v2956_v49 }
 0x2f7   :  { %v2969_v57 = vor.u32 1.1754944e-38, %v2968_v53  ;;  %vm2967_vm4 = vcmp.eq.f32.partialorder %v2966_v55, 8.507059e+37 }
 0x2fb   :  { %v4753_v63 = vpop.eup %4752 }
 0x2fc   :  { %v2958_v51 = vmul.f32 %v4753_v63, %v2956_v49  ;;  %vm2963_vm0 = vweird.f32 %v4753_v63 }
 0x2fd   :  { %vm2964_vm2 = vmor %vm2962_vm1, %vm2963_vm0 }
 0x2fe   :  { %v2959_v52 = vsub.f32 1.0, %v2958_v51 }
 0x300   :  { %v2960_v54 = vmul.f32 %v4753_v63, %v2959_v52 }
 0x302   :  { %v2961_v56 = vadd.f32 %v4753_v63, %v2960_v54 }
 0x304   :  { %v2965_v58 = vsel %vm2964_vm2, %v4753_v63, %v2961_v56 }
 0x305   :  { %v2970_v59 = vsel %vm2967_vm4, %v2969_v57, %v2965_v58 }
 0x306   :  { %2973 = vst.msk [vmem:[%s5072_s7] sm:$0xff] %vm2972_vm3, %v2970_v59 }
 0x307   :  { %2978 = vsyncpa [#allocation4], 1 }
 0x308   :  { %2979 = vsyncpa [#allocation6], 1 }
 0x309   :  { %2980 = vsyncpa [#allocation9], 1 }

</bundles_post_ra>
